<compile_context>
chip_gen: v7x
topology: tpu7x:2x2x1
jax: 0.10.0
libtpu: 0.0.40
codegen_flags: <defaults>
</compile_context>

<pallas_src>
import math

import jax
import jax.numpy as jnp
from jax.experimental import pallas as pl
from jax.experimental.pallas import tpu as pltpu  # noqa: F401  (TPU backend)

D_MODEL = 32
N_HEAD = 4
HEAD_DIM = D_MODEL // N_HEAD
DIM_FF = 64
LN_EPS = 1e-5


def _layernorm(x, w, b):
    mu = jnp.mean(x, axis=-1, keepdims=True)
    var = jnp.mean((x - mu) ** 2, axis=-1, keepdims=True)
    return (x - mu) * jax.lax.rsqrt(var + LN_EPS) * w + b


def block_kernel(src_ref, wqkv_ref, bqkv_ref, wo_ref, bo_ref,
                 w1_ref, b1_ref, w2_ref, b2_ref,
                 ln1w_ref, ln1b_ref, ln2w_ref, ln2b_ref, o_ref):
    """Fully fused pre-norm transformer Block; processes the whole batch."""
    S, B, E = src_ref.shape
    H, hd = N_HEAD, HEAD_DIM
    scale = 1.0 / math.sqrt(hd)

    src = src_ref[...].astype(jnp.float32)            # (S, B, E)
    wqkv = wqkv_ref[...]                              # (E, 3E)
    wo = wo_ref[...]                                  # (E, E)
    w1 = w1_ref[...]                                  # (E, F)
    w2 = w2_ref[...]                                  # (F, E)
    bqkv, bo = bqkv_ref[0], bo_ref[0]
    b1, b2 = b1_ref[0], b2_ref[0]
    ln1w, ln1b = ln1w_ref[0], ln1b_ref[0]
    ln2w, ln2b = ln2w_ref[0], ln2b_ref[0]

    # Static unroll over the tiny batch: all ops stay 2-D (S, *) slabs, no
    # per-grid-step overhead, no intermediate HBM round trips.
    for b in range(B):
        xb = src[:, b, :]                             # (S, E)

        # ---- norm_first: x = LayerNorm1(src)  (replaces x, per Block.forward)
        x = _layernorm(xb, ln1w, ln1b)

        # ---- self-attention (fused QKV projection; q pre-scaled) ----
        qkv = jnp.dot(x, wqkv, preferred_element_type=jnp.float32) + bqkv
        q = qkv[:, :E] * scale
        k = qkv[:, E:2 * E]
        v = qkv[:, 2 * E:]

        # Per-head loop with the output projection folded in, so no
        # lane-dimension concatenate of head outputs is needed.
        attn = jnp.zeros((S, E), jnp.float32)
        for h in range(H):
            sl = slice(h * hd, (h + 1) * hd)
            s = jnp.dot(q[:, sl], k[:, sl].T,
                        preferred_element_type=jnp.float32)       # (S, S)
            s = s - jnp.max(s, axis=-1, keepdims=True)
            p = jnp.exp(s)
            p = p * pl.reciprocal(jnp.sum(p, axis=-1, keepdims=True),
                                  approx=True)
            ctx = jnp.dot(p, v[:, sl],
                          preferred_element_type=jnp.float32)     # (S, hd)
            attn = attn + jnp.dot(ctx, wo[sl, :],
                                  preferred_element_type=jnp.float32)
        attn = attn + bo

        # residual 1  (dropout1 is identity: p = 0.0)
        x = x + attn

        # ---- feed-forward on LayerNorm2(x):  Linear -> ReLU -> Linear ----
        y = _layernorm(x, ln2w, ln2b)
        h1 = jnp.maximum(
            jnp.dot(y, w1, preferred_element_type=jnp.float32) + b1, 0.0)
        h2 = jnp.dot(h1, w2, preferred_element_type=jnp.float32) + b2

        # residual 2  (dropout2 is identity)
        x = x + h2

        o_ref[:, b, :] = x.astype(o_ref.dtype)


def block_forward(src, params):
    """src: (seq, batch, d_model) — PyTorch batch_first=False convention."""
    S, B, E = src.shape
    return pl.pallas_call(
        block_kernel,
        out_shape=jax.ShapeDtypeStruct((S, B, E), src.dtype),
    )(src, *params)


def init_params(key):
    # NOTE: weights are stored pre-transposed for `x @ W` use:
    #   PyTorch in_proj_weight is (3E, E) applied as x @ W.T -> here (E, 3E);
    #   the same applies to out_proj / linear1 / linear2.
    k1, k2, k3, k4 = jax.random.split(key, 4)
    wqkv = jax.random.normal(k1, (D_MODEL, 3 * D_MODEL), jnp.float32) * 0.05
    wo = jax.random.normal(k2, (D_MODEL, D_MODEL), jnp.float32) * 0.05
    w1 = jax.random.normal(k3, (D_MODEL, DIM_FF), jnp.float32) * 0.05
    w2 = jax.random.normal(k4, (DIM_FF, D_MODEL), jnp.float32) * 0.05

    zeros = lambda n: jnp.zeros((1, n), jnp.float32)
    ones = lambda n: jnp.ones((1, n), jnp.float32)

    return (
        wqkv, zeros(3 * D_MODEL),          # in_proj weight / bias
        wo, zeros(D_MODEL),                # out_proj weight / bias
        w1, zeros(DIM_FF),                 # linear1
        w2, zeros(D_MODEL),                # linear2
        ones(D_MODEL), zeros(D_MODEL),     # norm1 gamma / beta
        ones(D_MODEL), zeros(D_MODEL),     # norm2 gamma / beta
    )


if __name__ == "__main__":
    key = jax.random.PRNGKey(0)
    k_src, k_params = jax.random.split(key)

    SEQ, BATCH = 8, 2
    src = jax.random.normal(k_src, (SEQ, BATCH, D_MODEL), jnp.float32)
    params = init_params(k_params)

    out = block_forward(src, params)
    out = jax.block_until_ready(out)

    assert out.shape == (SEQ, BATCH, D_MODEL)
    assert jnp.all(jnp.isfinite(out))
    print("KERNEL_OK")
</pallas_src>

<mosaic_0001>
module attributes {stable_mosaic.version = 11 : i64} {
  func.func @block_kernel(%arg0: memref<8x2x32xf32, #tpu.memory_space<vmem>>, %arg1: memref<32x96xf32, #tpu.memory_space<vmem>>, %arg2: memref<1x96xf32, #tpu.memory_space<vmem>>, %arg3: memref<32x32xf32, #tpu.memory_space<vmem>>, %arg4: memref<1x32xf32, #tpu.memory_space<vmem>>, %arg5: memref<32x64xf32, #tpu.memory_space<vmem>>, %arg6: memref<1x64xf32, #tpu.memory_space<vmem>>, %arg7: memref<64x32xf32, #tpu.memory_space<vmem>>, %arg8: memref<1x32xf32, #tpu.memory_space<vmem>>, %arg9: memref<1x32xf32, #tpu.memory_space<vmem>>, %arg10: memref<1x32xf32, #tpu.memory_space<vmem>>, %arg11: memref<1x32xf32, #tpu.memory_space<vmem>>, %arg12: memref<1x32xf32, #tpu.memory_space<vmem>>, %arg13: memref<8x2x32xf32, #tpu.memory_space<vmem>>) attributes {dimension_semantics = [], scalar_prefetch = 0 : i64, scratch_operands = 0 : i64, tpu.core_type = #tpu.core_type<tc>} {
    %c0 = arith.constant 0 : index
    %c0_0 = arith.constant 0 : index
    %c0_1 = arith.constant 0 : index
    %0 = vector.load %arg0[%c0, %c0_0, %c0_1] : memref<8x2x32xf32, #tpu.memory_space<vmem>>, vector<8x2x32xf32>
    %c0_2 = arith.constant 0 : index
    %c0_3 = arith.constant 0 : index
    %1 = vector.load %arg1[%c0_2, %c0_3] : memref<32x96xf32, #tpu.memory_space<vmem>>, vector<32x96xf32>
    %c0_4 = arith.constant 0 : index
    %c0_5 = arith.constant 0 : index
    %2 = vector.load %arg3[%c0_4, %c0_5] : memref<32x32xf32, #tpu.memory_space<vmem>>, vector<32x32xf32>
    %c0_6 = arith.constant 0 : index
    %c0_7 = arith.constant 0 : index
    %3 = vector.load %arg5[%c0_6, %c0_7] : memref<32x64xf32, #tpu.memory_space<vmem>>, vector<32x64xf32>
    %c0_8 = arith.constant 0 : index
    %c0_9 = arith.constant 0 : index
    %4 = vector.load %arg7[%c0_8, %c0_9] : memref<64x32xf32, #tpu.memory_space<vmem>>, vector<64x32xf32>
    %c0_10 = arith.constant 0 : index
    %c0_11 = arith.constant 0 : index
    %5 = vector.load %arg2[%c0_10, %c0_11] : memref<1x96xf32, #tpu.memory_space<vmem>>, vector<1x96xf32>
    %6 = vector.shape_cast %5 : vector<1x96xf32> to vector<96xf32>
    %c0_12 = arith.constant 0 : index
    %c0_13 = arith.constant 0 : index
    %7 = vector.load %arg4[%c0_12, %c0_13] : memref<1x32xf32, #tpu.memory_space<vmem>>, vector<1x32xf32>
    %8 = vector.shape_cast %7 : vector<1x32xf32> to vector<32xf32>
    %c0_14 = arith.constant 0 : index
    %c0_15 = arith.constant 0 : index
    %9 = vector.load %arg6[%c0_14, %c0_15] : memref<1x64xf32, #tpu.memory_space<vmem>>, vector<1x64xf32>
    %10 = vector.shape_cast %9 : vector<1x64xf32> to vector<64xf32>
    %c0_16 = arith.constant 0 : index
    %c0_17 = arith.constant 0 : index
    %11 = vector.load %arg8[%c0_16, %c0_17] : memref<1x32xf32, #tpu.memory_space<vmem>>, vector<1x32xf32>
    %12 = vector.shape_cast %11 : vector<1x32xf32> to vector<32xf32>
    %c0_18 = arith.constant 0 : index
    %c0_19 = arith.constant 0 : index
    %13 = vector.load %arg9[%c0_18, %c0_19] : memref<1x32xf32, #tpu.memory_space<vmem>>, vector<1x32xf32>
    %14 = vector.shape_cast %13 : vector<1x32xf32> to vector<32xf32>
    %c0_20 = arith.constant 0 : index
    %c0_21 = arith.constant 0 : index
    %15 = vector.load %arg10[%c0_20, %c0_21] : memref<1x32xf32, #tpu.memory_space<vmem>>, vector<1x32xf32>
    %16 = vector.shape_cast %15 : vector<1x32xf32> to vector<32xf32>
    %c0_22 = arith.constant 0 : index
    %c0_23 = arith.constant 0 : index
    %17 = vector.load %arg11[%c0_22, %c0_23] : memref<1x32xf32, #tpu.memory_space<vmem>>, vector<1x32xf32>
    %18 = vector.shape_cast %17 : vector<1x32xf32> to vector<32xf32>
    %c0_24 = arith.constant 0 : index
    %c0_25 = arith.constant 0 : index
    %19 = vector.load %arg12[%c0_24, %c0_25] : memref<1x32xf32, #tpu.memory_space<vmem>>, vector<1x32xf32>
    %20 = vector.shape_cast %19 : vector<1x32xf32> to vector<32xf32>
    %21 = vector.extract_strided_slice %0 {offsets = [0, 0, 0], sizes = [8, 1, 32], strides = [1, 1, 1]} : vector<8x2x32xf32> to vector<8x1x32xf32>
    %22 = vector.shape_cast %21 : vector<8x1x32xf32> to vector<8x32xf32>
    %cst = arith.constant dense<0.000000e+00> : vector<8xf32>
    %23 = vector.multi_reduction <add>, %22, %cst [1] : vector<8x32xf32> to vector<8xf32>
    %24 = vector.shape_cast %23 : vector<8xf32> to vector<8x1xf32>
    %cst_26 = arith.constant 3.200000e+01 : f32
    %25 = vector.broadcast %cst_26 : f32 to vector<8x1xf32>
    %26 = arith.divf %24, %25 : vector<8x1xf32>
    %27 = vector.broadcast %26 : vector<8x1xf32> to vector<8x32xf32>
    %28 = arith.subf %22, %27 : vector<8x32xf32>
    %29 = arith.mulf %28, %28 : vector<8x32xf32>
    %cst_27 = arith.constant dense<0.000000e+00> : vector<8xf32>
    %30 = vector.multi_reduction <add>, %29, %cst_27 [1] : vector<8x32xf32> to vector<8xf32>
    %31 = vector.shape_cast %30 : vector<8xf32> to vector<8x1xf32>
    %cst_28 = arith.constant 3.200000e+01 : f32
    %32 = vector.broadcast %cst_28 : f32 to vector<8x1xf32>
    %33 = arith.divf %31, %32 : vector<8x1xf32>
    %34 = vector.broadcast %26 : vector<8x1xf32> to vector<8x32xf32>
    %35 = arith.subf %22, %34 : vector<8x32xf32>
    %cst_29 = arith.constant 9.99999974E-6 : f32
    %36 = vector.broadcast %cst_29 : f32 to vector<8x1xf32>
    %37 = arith.addf %33, %36 : vector<8x1xf32>
    %38 = math.rsqrt %37 : vector<8x1xf32>
    %39 = vector.broadcast %38 : vector<8x1xf32> to vector<8x32xf32>
    %40 = arith.mulf %35, %39 : vector<8x32xf32>
    %41 = vector.shape_cast %14 : vector<32xf32> to vector<1x32xf32>
    %42 = vector.broadcast %41 : vector<1x32xf32> to vector<8x32xf32>
    %43 = arith.mulf %40, %42 : vector<8x32xf32>
    %44 = vector.shape_cast %16 : vector<32xf32> to vector<1x32xf32>
    %45 = vector.broadcast %44 : vector<1x32xf32> to vector<8x32xf32>
    %46 = arith.addf %43, %45 : vector<8x32xf32>
    %cst_30 = arith.constant dense<0.000000e+00> : vector<8x96xf32>
    %47 = tpu.matmul %46, %1, %cst_30 {dimension_numbers = #tpu.dot_dimension_numbers<[1], [0], [0], [1], [0, 0, 1, 1], [], []>} : vector<8x32xf32>, vector<32x96xf32>, vector<8x96xf32> -> vector<8x96xf32>
    %48 = vector.shape_cast %6 : vector<96xf32> to vector<1x96xf32>
    %49 = vector.broadcast %48 : vector<1x96xf32> to vector<8x96xf32>
    %50 = arith.addf %47, %49 : vector<8x96xf32>
    %51 = vector.extract_strided_slice %50 {offsets = [0, 0], sizes = [8, 32], strides = [1, 1]} : vector<8x96xf32> to vector<8x32xf32>
    %cst_31 = arith.constant 0.353553385 : f32
    %52 = vector.broadcast %cst_31 : f32 to vector<8x32xf32>
    %53 = arith.mulf %51, %52 : vector<8x32xf32>
    %54 = vector.extract_strided_slice %50 {offsets = [0, 32], sizes = [8, 32], strides = [1, 1]} : vector<8x96xf32> to vector<8x32xf32>
    %55 = vector.extract_strided_slice %50 {offsets = [0, 64], sizes = [8, 32], strides = [1, 1]} : vector<8x96xf32> to vector<8x32xf32>
    %cst_32 = arith.constant 0.000000e+00 : f32
    %56 = vector.broadcast %cst_32 : f32 to vector<8x32xf32>
    %57 = vector.extract_strided_slice %53 {offsets = [0, 0], sizes = [8, 8], strides = [1, 1]} : vector<8x32xf32> to vector<8x8xf32>
    %58 = vector.extract_strided_slice %54 {offsets = [0, 0], sizes = [8, 8], strides = [1, 1]} : vector<8x32xf32> to vector<8x8xf32>
    %59 = tpu.transpose %58, [1, 0] : vector<8x8xf32> -> vector<8x8xf32>
    %cst_33 = arith.constant dense<0.000000e+00> : vector<8x8xf32>
    %60 = tpu.matmul %57, %59, %cst_33 {dimension_numbers = #tpu.dot_dimension_numbers<[1], [0], [0], [1], [0, 0, 1, 1], [], []>} : vector<8x8xf32>, vector<8x8xf32>, vector<8x8xf32> -> vector<8x8xf32>
    %cst_34 = arith.constant dense<0xFF800000> : vector<8xf32>
    %61 = vector.multi_reduction <maximumf>, %60, %cst_34 [1] : vector<8x8xf32> to vector<8xf32>
    %62 = vector.shape_cast %61 : vector<8xf32> to vector<8x1xf32>
    %63 = vector.broadcast %62 : vector<8x1xf32> to vector<8x8xf32>
    %64 = arith.subf %60, %63 : vector<8x8xf32>
    %65 = math.exp %64 : vector<8x8xf32>
    %cst_35 = arith.constant dense<0.000000e+00> : vector<8xf32>
    %66 = vector.multi_reduction <add>, %65, %cst_35 [1] : vector<8x8xf32> to vector<8xf32>
    %67 = vector.shape_cast %66 : vector<8xf32> to vector<8x1xf32>
    %68 = tpu.reciprocal %67 {approx = true} : vector<8x1xf32> -> vector<8x1xf32>
    %69 = vector.broadcast %68 : vector<8x1xf32> to vector<8x8xf32>
    %70 = arith.mulf %65, %69 : vector<8x8xf32>
    %71 = vector.extract_strided_slice %55 {offsets = [0, 0], sizes = [8, 8], strides = [1, 1]} : vector<8x32xf32> to vector<8x8xf32>
    %cst_36 = arith.constant dense<0.000000e+00> : vector<8x8xf32>
    %72 = tpu.matmul %70, %71, %cst_36 {dimension_numbers = #tpu.dot_dimension_numbers<[1], [0], [0], [1], [0, 0, 1, 1], [], []>} : vector<8x8xf32>, vector<8x8xf32>, vector<8x8xf32> -> vector<8x8xf32>
    %73 = vector.extract_strided_slice %2 {offsets = [0, 0], sizes = [8, 32], strides = [1, 1]} : vector<32x32xf32> to vector<8x32xf32>
    %cst_37 = arith.constant dense<0.000000e+00> : vector<8x32xf32>
    %74 = tpu.matmul %72, %73, %cst_37 {dimension_numbers = #tpu.dot_dimension_numbers<[1], [0], [0], [1], [0, 0, 1, 1], [], []>} : vector<8x8xf32>, vector<8x32xf32>, vector<8x32xf32> -> vector<8x32xf32>
    %75 = arith.addf %56, %74 : vector<8x32xf32>
    %76 = vector.extract_strided_slice %53 {offsets = [0, 8], sizes = [8, 8], strides = [1, 1]} : vector<8x32xf32> to vector<8x8xf32>
    %77 = vector.extract_strided_slice %54 {offsets = [0, 8], sizes = [8, 8], strides = [1, 1]} : vector<8x32xf32> to vector<8x8xf32>
    %78 = tpu.transpose %77, [1, 0] : vector<8x8xf32> -> vector<8x8xf32>
    %cst_38 = arith.constant dense<0.000000e+00> : vector<8x8xf32>
    %79 = tpu.matmul %76, %78, %cst_38 {dimension_numbers = #tpu.dot_dimension_numbers<[1], [0], [0], [1], [0, 0, 1, 1], [], []>} : vector<8x8xf32>, vector<8x8xf32>, vector<8x8xf32> -> vector<8x8xf32>
    %cst_39 = arith.constant dense<0xFF800000> : vector<8xf32>
    %80 = vector.multi_reduction <maximumf>, %79, %cst_39 [1] : vector<8x8xf32> to vector<8xf32>
    %81 = vector.shape_cast %80 : vector<8xf32> to vector<8x1xf32>
    %82 = vector.broadcast %81 : vector<8x1xf32> to vector<8x8xf32>
    %83 = arith.subf %79, %82 : vector<8x8xf32>
    %84 = math.exp %83 : vector<8x8xf32>
    %cst_40 = arith.constant dense<0.000000e+00> : vector<8xf32>
    %85 = vector.multi_reduction <add>, %84, %cst_40 [1] : vector<8x8xf32> to vector<8xf32>
    %86 = vector.shape_cast %85 : vector<8xf32> to vector<8x1xf32>
    %87 = tpu.reciprocal %86 {approx = true} : vector<8x1xf32> -> vector<8x1xf32>
    %88 = vector.broadcast %87 : vector<8x1xf32> to vector<8x8xf32>
    %89 = arith.mulf %84, %88 : vector<8x8xf32>
    %90 = vector.extract_strided_slice %55 {offsets = [0, 8], sizes = [8, 8], strides = [1, 1]} : vector<8x32xf32> to vector<8x8xf32>
    %cst_41 = arith.constant dense<0.000000e+00> : vector<8x8xf32>
    %91 = tpu.matmul %89, %90, %cst_41 {dimension_numbers = #tpu.dot_dimension_numbers<[1], [0], [0], [1], [0, 0, 1, 1], [], []>} : vector<8x8xf32>, vector<8x8xf32>, vector<8x8xf32> -> vector<8x8xf32>
    %92 = vector.extract_strided_slice %2 {offsets = [8, 0], sizes = [8, 32], strides = [1, 1]} : vector<32x32xf32> to vector<8x32xf32>
    %cst_42 = arith.constant dense<0.000000e+00> : vector<8x32xf32>
    %93 = tpu.matmul %91, %92, %cst_42 {dimension_numbers = #tpu.dot_dimension_numbers<[1], [0], [0], [1], [0, 0, 1, 1], [], []>} : vector<8x8xf32>, vector<8x32xf32>, vector<8x32xf32> -> vector<8x32xf32>
    %94 = arith.addf %75, %93 : vector<8x32xf32>
    %95 = vector.extract_strided_slice %53 {offsets = [0, 16], sizes = [8, 8], strides = [1, 1]} : vector<8x32xf32> to vector<8x8xf32>
    %96 = vector.extract_strided_slice %54 {offsets = [0, 16], sizes = [8, 8], strides = [1, 1]} : vector<8x32xf32> to vector<8x8xf32>
    %97 = tpu.transpose %96, [1, 0] : vector<8x8xf32> -> vector<8x8xf32>
    %cst_43 = arith.constant dense<0.000000e+00> : vector<8x8xf32>
    %98 = tpu.matmul %95, %97, %cst_43 {dimension_numbers = #tpu.dot_dimension_numbers<[1], [0], [0], [1], [0, 0, 1, 1], [], []>} : vector<8x8xf32>, vector<8x8xf32>, vector<8x8xf32> -> vector<8x8xf32>
    %cst_44 = arith.constant dense<0xFF800000> : vector<8xf32>
    %99 = vector.multi_reduction <maximumf>, %98, %cst_44 [1] : vector<8x8xf32> to vector<8xf32>
    %100 = vector.shape_cast %99 : vector<8xf32> to vector<8x1xf32>
    %101 = vector.broadcast %100 : vector<8x1xf32> to vector<8x8xf32>
    %102 = arith.subf %98, %101 : vector<8x8xf32>
    %103 = math.exp %102 : vector<8x8xf32>
    %cst_45 = arith.constant dense<0.000000e+00> : vector<8xf32>
    %104 = vector.multi_reduction <add>, %103, %cst_45 [1] : vector<8x8xf32> to vector<8xf32>
    %105 = vector.shape_cast %104 : vector<8xf32> to vector<8x1xf32>
    %106 = tpu.reciprocal %105 {approx = true} : vector<8x1xf32> -> vector<8x1xf32>
    %107 = vector.broadcast %106 : vector<8x1xf32> to vector<8x8xf32>
    %108 = arith.mulf %103, %107 : vector<8x8xf32>
    %109 = vector.extract_strided_slice %55 {offsets = [0, 16], sizes = [8, 8], strides = [1, 1]} : vector<8x32xf32> to vector<8x8xf32>
    %cst_46 = arith.constant dense<0.000000e+00> : vector<8x8xf32>
    %110 = tpu.matmul %108, %109, %cst_46 {dimension_numbers = #tpu.dot_dimension_numbers<[1], [0], [0], [1], [0, 0, 1, 1], [], []>} : vector<8x8xf32>, vector<8x8xf32>, vector<8x8xf32> -> vector<8x8xf32>
    %111 = vector.extract_strided_slice %2 {offsets = [16, 0], sizes = [8, 32], strides = [1, 1]} : vector<32x32xf32> to vector<8x32xf32>
    %cst_47 = arith.constant dense<0.000000e+00> : vector<8x32xf32>
    %112 = tpu.matmul %110, %111, %cst_47 {dimension_numbers = #tpu.dot_dimension_numbers<[1], [0], [0], [1], [0, 0, 1, 1], [], []>} : vector<8x8xf32>, vector<8x32xf32>, vector<8x32xf32> -> vector<8x32xf32>
    %113 = arith.addf %94, %112 : vector<8x32xf32>
    %114 = vector.extract_strided_slice %53 {offsets = [0, 24], sizes = [8, 8], strides = [1, 1]} : vector<8x32xf32> to vector<8x8xf32>
    %115 = vector.extract_strided_slice %54 {offsets = [0, 24], sizes = [8, 8], strides = [1, 1]} : vector<8x32xf32> to vector<8x8xf32>
    %116 = tpu.transpose %115, [1, 0] : vector<8x8xf32> -> vector<8x8xf32>
    %cst_48 = arith.constant dense<0.000000e+00> : vector<8x8xf32>
    %117 = tpu.matmul %114, %116, %cst_48 {dimension_numbers = #tpu.dot_dimension_numbers<[1], [0], [0], [1], [0, 0, 1, 1], [], []>} : vector<8x8xf32>, vector<8x8xf32>, vector<8x8xf32> -> vector<8x8xf32>
    %cst_49 = arith.constant dense<0xFF800000> : vector<8xf32>
    %118 = vector.multi_reduction <maximumf>, %117, %cst_49 [1] : vector<8x8xf32> to vector<8xf32>
    %119 = vector.shape_cast %118 : vector<8xf32> to vector<8x1xf32>
    %120 = vector.broadcast %119 : vector<8x1xf32> to vector<8x8xf32>
    %121 = arith.subf %117, %120 : vector<8x8xf32>
    %122 = math.exp %121 : vector<8x8xf32>
    %cst_50 = arith.constant dense<0.000000e+00> : vector<8xf32>
    %123 = vector.multi_reduction <add>, %122, %cst_50 [1] : vector<8x8xf32> to vector<8xf32>
    %124 = vector.shape_cast %123 : vector<8xf32> to vector<8x1xf32>
    %125 = tpu.reciprocal %124 {approx = true} : vector<8x1xf32> -> vector<8x1xf32>
    %126 = vector.broadcast %125 : vector<8x1xf32> to vector<8x8xf32>
    %127 = arith.mulf %122, %126 : vector<8x8xf32>
    %128 = vector.extract_strided_slice %55 {offsets = [0, 24], sizes = [8, 8], strides = [1, 1]} : vector<8x32xf32> to vector<8x8xf32>
    %cst_51 = arith.constant dense<0.000000e+00> : vector<8x8xf32>
    %129 = tpu.matmul %127, %128, %cst_51 {dimension_numbers = #tpu.dot_dimension_numbers<[1], [0], [0], [1], [0, 0, 1, 1], [], []>} : vector<8x8xf32>, vector<8x8xf32>, vector<8x8xf32> -> vector<8x8xf32>
    %130 = vector.extract_strided_slice %2 {offsets = [24, 0], sizes = [8, 32], strides = [1, 1]} : vector<32x32xf32> to vector<8x32xf32>
    %cst_52 = arith.constant dense<0.000000e+00> : vector<8x32xf32>
    %131 = tpu.matmul %129, %130, %cst_52 {dimension_numbers = #tpu.dot_dimension_numbers<[1], [0], [0], [1], [0, 0, 1, 1], [], []>} : vector<8x8xf32>, vector<8x32xf32>, vector<8x32xf32> -> vector<8x32xf32>
    %132 = arith.addf %113, %131 : vector<8x32xf32>
    %133 = vector.shape_cast %8 : vector<32xf32> to vector<1x32xf32>
    %134 = vector.broadcast %133 : vector<1x32xf32> to vector<8x32xf32>
    %135 = arith.addf %132, %134 : vector<8x32xf32>
    %136 = arith.addf %46, %135 : vector<8x32xf32>
    %cst_53 = arith.constant dense<0.000000e+00> : vector<8xf32>
    %137 = vector.multi_reduction <add>, %136, %cst_53 [1] : vector<8x32xf32> to vector<8xf32>
    %138 = vector.shape_cast %137 : vector<8xf32> to vector<8x1xf32>
    %cst_54 = arith.constant 3.200000e+01 : f32
    %139 = vector.broadcast %cst_54 : f32 to vector<8x1xf32>
    %140 = arith.divf %138, %139 : vector<8x1xf32>
    %141 = vector.broadcast %140 : vector<8x1xf32> to vector<8x32xf32>
    %142 = arith.subf %136, %141 : vector<8x32xf32>
    %143 = arith.mulf %142, %142 : vector<8x32xf32>
    %cst_55 = arith.constant dense<0.000000e+00> : vector<8xf32>
    %144 = vector.multi_reduction <add>, %143, %cst_55 [1] : vector<8x32xf32> to vector<8xf32>
    %145 = vector.shape_cast %144 : vector<8xf32> to vector<8x1xf32>
    %cst_56 = arith.constant 3.200000e+01 : f32
    %146 = vector.broadcast %cst_56 : f32 to vector<8x1xf32>
    %147 = arith.divf %145, %146 : vector<8x1xf32>
    %148 = vector.broadcast %140 : vector<8x1xf32> to vector<8x32xf32>
    %149 = arith.subf %136, %148 : vector<8x32xf32>
    %cst_57 = arith.constant 9.99999974E-6 : f32
    %150 = vector.broadcast %cst_57 : f32 to vector<8x1xf32>
    %151 = arith.addf %147, %150 : vector<8x1xf32>
    %152 = math.rsqrt %151 : vector<8x1xf32>
    %153 = vector.broadcast %152 : vector<8x1xf32> to vector<8x32xf32>
    %154 = arith.mulf %149, %153 : vector<8x32xf32>
    %155 = vector.shape_cast %18 : vector<32xf32> to vector<1x32xf32>
    %156 = vector.broadcast %155 : vector<1x32xf32> to vector<8x32xf32>
    %157 = arith.mulf %154, %156 : vector<8x32xf32>
    %158 = vector.shape_cast %20 : vector<32xf32> to vector<1x32xf32>
    %159 = vector.broadcast %158 : vector<1x32xf32> to vector<8x32xf32>
    %160 = arith.addf %157, %159 : vector<8x32xf32>
    %cst_58 = arith.constant dense<0.000000e+00> : vector<8x64xf32>
    %161 = tpu.matmul %160, %3, %cst_58 {dimension_numbers = #tpu.dot_dimension_numbers<[1], [0], [0], [1], [0, 0, 1, 1], [], []>} : vector<8x32xf32>, vector<32x64xf32>, vector<8x64xf32> -> vector<8x64xf32>
    %162 = vector.shape_cast %10 : vector<64xf32> to vector<1x64xf32>
    %163 = vector.broadcast %162 : vector<1x64xf32> to vector<8x64xf32>
    %164 = arith.addf %161, %163 : vector<8x64xf32>
    %cst_59 = arith.constant 0.000000e+00 : f32
    %165 = vector.broadcast %cst_59 : f32 to vector<8x64xf32>
    %166 = arith.maximumf %164, %165 : vector<8x64xf32>
    %cst_60 = arith.constant dense<0.000000e+00> : vector<8x32xf32>
    %167 = tpu.matmul %166, %4, %cst_60 {dimension_numbers = #tpu.dot_dimension_numbers<[1], [0], [0], [1], [0, 0, 1, 1], [], []>} : vector<8x64xf32>, vector<64x32xf32>, vector<8x32xf32> -> vector<8x32xf32>
    %168 = vector.shape_cast %12 : vector<32xf32> to vector<1x32xf32>
    %169 = vector.broadcast %168 : vector<1x32xf32> to vector<8x32xf32>
    %170 = arith.addf %167, %169 : vector<8x32xf32>
    %171 = arith.addf %136, %170 : vector<8x32xf32>
    %c0_61 = arith.constant 0 : index
    %c0_62 = arith.constant 0 : index
    %c0_63 = arith.constant 0 : index
    %172 = vector.load %arg13[%c0_61, %c0_62, %c0_63] : memref<8x2x32xf32, #tpu.memory_space<vmem>>, vector<8x1x32xf32>
    %173 = vector.shape_cast %172 : vector<8x1x32xf32> to vector<8x32xf32>
    %174 = vector.shape_cast %171 : vector<8x32xf32> to vector<8x1x32xf32>
    tpu.vector_store %arg13[%c0_61, %c0_62, %c0_63], %174 {strides = array<i32>} : memref<8x2x32xf32, #tpu.memory_space<vmem>>, vector<8x1x32xf32>,
    %175 = vector.extract_strided_slice %0 {offsets = [0, 1, 0], sizes = [8, 1, 32], strides = [1, 1, 1]} : vector<8x2x32xf32> to vector<8x1x32xf32>
    %176 = vector.shape_cast %175 : vector<8x1x32xf32> to vector<8x32xf32>
    %cst_64 = arith.constant dense<0.000000e+00> : vector<8xf32>
    %177 = vector.multi_reduction <add>, %176, %cst_64 [1] : vector<8x32xf32> to vector<8xf32>
    %178 = vector.shape_cast %177 : vector<8xf32> to vector<8x1xf32>
    %cst_65 = arith.constant 3.200000e+01 : f32
    %179 = vector.broadcast %cst_65 : f32 to vector<8x1xf32>
    %180 = arith.divf %178, %179 : vector<8x1xf32>
    %181 = vector.broadcast %180 : vector<8x1xf32> to vector<8x32xf32>
    %182 = arith.subf %176, %181 : vector<8x32xf32>
    %183 = arith.mulf %182, %182 : vector<8x32xf32>
    %cst_66 = arith.constant dense<0.000000e+00> : vector<8xf32>
    %184 = vector.multi_reduction <add>, %183, %cst_66 [1] : vector<8x32xf32> to vector<8xf32>
    %185 = vector.shape_cast %184 : vector<8xf32> to vector<8x1xf32>
    %cst_67 = arith.constant 3.200000e+01 : f32
    %186 = vector.broadcast %cst_67 : f32 to vector<8x1xf32>
    %187 = arith.divf %185, %186 : vector<8x1xf32>
    %188 = vector.broadcast %180 : vector<8x1xf32> to vector<8x32xf32>
    %189 = arith.subf %176, %188 : vector<8x32xf32>
    %cst_68 = arith.constant 9.99999974E-6 : f32
    %190 = vector.broadcast %cst_68 : f32 to vector<8x1xf32>
    %191 = arith.addf %187, %190 : vector<8x1xf32>
    %192 = math.rsqrt %191 : vector<8x1xf32>
    %193 = vector.broadcast %192 : vector<8x1xf32> to vector<8x32xf32>
    %194 = arith.mulf %189, %193 : vector<8x32xf32>
    %195 = vector.shape_cast %14 : vector<32xf32> to vector<1x32xf32>
    %196 = vector.broadcast %195 : vector<1x32xf32> to vector<8x32xf32>
    %197 = arith.mulf %194, %196 : vector<8x32xf32>
    %198 = vector.shape_cast %16 : vector<32xf32> to vector<1x32xf32>
    %199 = vector.broadcast %198 : vector<1x32xf32> to vector<8x32xf32>
    %200 = arith.addf %197, %199 : vector<8x32xf32>
    %cst_69 = arith.constant dense<0.000000e+00> : vector<8x96xf32>
    %201 = tpu.matmul %200, %1, %cst_69 {dimension_numbers = #tpu.dot_dimension_numbers<[1], [0], [0], [1], [0, 0, 1, 1], [], []>} : vector<8x32xf32>, vector<32x96xf32>, vector<8x96xf32> -> vector<8x96xf32>
    %202 = vector.shape_cast %6 : vector<96xf32> to vector<1x96xf32>
    %203 = vector.broadcast %202 : vector<1x96xf32> to vector<8x96xf32>
    %204 = arith.addf %201, %203 : vector<8x96xf32>
    %205 = vector.extract_strided_slice %204 {offsets = [0, 0], sizes = [8, 32], strides = [1, 1]} : vector<8x96xf32> to vector<8x32xf32>
    %cst_70 = arith.constant 0.353553385 : f32
    %206 = vector.broadcast %cst_70 : f32 to vector<8x32xf32>
    %207 = arith.mulf %205, %206 : vector<8x32xf32>
    %208 = vector.extract_strided_slice %204 {offsets = [0, 32], sizes = [8, 32], strides = [1, 1]} : vector<8x96xf32> to vector<8x32xf32>
    %209 = vector.extract_strided_slice %204 {offsets = [0, 64], sizes = [8, 32], strides = [1, 1]} : vector<8x96xf32> to vector<8x32xf32>
    %cst_71 = arith.constant 0.000000e+00 : f32
    %210 = vector.broadcast %cst_71 : f32 to vector<8x32xf32>
    %211 = vector.extract_strided_slice %207 {offsets = [0, 0], sizes = [8, 8], strides = [1, 1]} : vector<8x32xf32> to vector<8x8xf32>
    %212 = vector.extract_strided_slice %208 {offsets = [0, 0], sizes = [8, 8], strides = [1, 1]} : vector<8x32xf32> to vector<8x8xf32>
    %213 = tpu.transpose %212, [1, 0] : vector<8x8xf32> -> vector<8x8xf32>
    %cst_72 = arith.constant dense<0.000000e+00> : vector<8x8xf32>
    %214 = tpu.matmul %211, %213, %cst_72 {dimension_numbers = #tpu.dot_dimension_numbers<[1], [0], [0], [1], [0, 0, 1, 1], [], []>} : vector<8x8xf32>, vector<8x8xf32>, vector<8x8xf32> -> vector<8x8xf32>
    %cst_73 = arith.constant dense<0xFF800000> : vector<8xf32>
    %215 = vector.multi_reduction <maximumf>, %214, %cst_73 [1] : vector<8x8xf32> to vector<8xf32>
    %216 = vector.shape_cast %215 : vector<8xf32> to vector<8x1xf32>
    %217 = vector.broadcast %216 : vector<8x1xf32> to vector<8x8xf32>
    %218 = arith.subf %214, %217 : vector<8x8xf32>
    %219 = math.exp %218 : vector<8x8xf32>
    %cst_74 = arith.constant dense<0.000000e+00> : vector<8xf32>
    %220 = vector.multi_reduction <add>, %219, %cst_74 [1] : vector<8x8xf32> to vector<8xf32>
    %221 = vector.shape_cast %220 : vector<8xf32> to vector<8x1xf32>
    %222 = tpu.reciprocal %221 {approx = true} : vector<8x1xf32> -> vector<8x1xf32>
    %223 = vector.broadcast %222 : vector<8x1xf32> to vector<8x8xf32>
    %224 = arith.mulf %219, %223 : vector<8x8xf32>
    %225 = vector.extract_strided_slice %209 {offsets = [0, 0], sizes = [8, 8], strides = [1, 1]} : vector<8x32xf32> to vector<8x8xf32>
    %cst_75 = arith.constant dense<0.000000e+00> : vector<8x8xf32>
    %226 = tpu.matmul %224, %225, %cst_75 {dimension_numbers = #tpu.dot_dimension_numbers<[1], [0], [0], [1], [0, 0, 1, 1], [], []>} : vector<8x8xf32>, vector<8x8xf32>, vector<8x8xf32> -> vector<8x8xf32>
    %227 = vector.extract_strided_slice %2 {offsets = [0, 0], sizes = [8, 32], strides = [1, 1]} : vector<32x32xf32> to vector<8x32xf32>
    %cst_76 = arith.constant dense<0.000000e+00> : vector<8x32xf32>
    %228 = tpu.matmul %226, %227, %cst_76 {dimension_numbers = #tpu.dot_dimension_numbers<[1], [0], [0], [1], [0, 0, 1, 1], [], []>} : vector<8x8xf32>, vector<8x32xf32>, vector<8x32xf32> -> vector<8x32xf32>
    %229 = arith.addf %210, %228 : vector<8x32xf32>
    %230 = vector.extract_strided_slice %207 {offsets = [0, 8], sizes = [8, 8], strides = [1, 1]} : vector<8x32xf32> to vector<8x8xf32>
    %231 = vector.extract_strided_slice %208 {offsets = [0, 8], sizes = [8, 8], strides = [1, 1]} : vector<8x32xf32> to vector<8x8xf32>
    %232 = tpu.transpose %231, [1, 0] : vector<8x8xf32> -> vector<8x8xf32>
    %cst_77 = arith.constant dense<0.000000e+00> : vector<8x8xf32>
    %233 = tpu.matmul %230, %232, %cst_77 {dimension_numbers = #tpu.dot_dimension_numbers<[1], [0], [0], [1], [0, 0, 1, 1], [], []>} : vector<8x8xf32>, vector<8x8xf32>, vector<8x8xf32> -> vector<8x8xf32>
    %cst_78 = arith.constant dense<0xFF800000> : vector<8xf32>
    %234 = vector.multi_reduction <maximumf>, %233, %cst_78 [1] : vector<8x8xf32> to vector<8xf32>
    %235 = vector.shape_cast %234 : vector<8xf32> to vector<8x1xf32>
    %236 = vector.broadcast %235 : vector<8x1xf32> to vector<8x8xf32>
    %237 = arith.subf %233, %236 : vector<8x8xf32>
    %238 = math.exp %237 : vector<8x8xf32>
    %cst_79 = arith.constant dense<0.000000e+00> : vector<8xf32>
    %239 = vector.multi_reduction <add>, %238, %cst_79 [1] : vector<8x8xf32> to vector<8xf32>
    %240 = vector.shape_cast %239 : vector<8xf32> to vector<8x1xf32>
    %241 = tpu.reciprocal %240 {approx = true} : vector<8x1xf32> -> vector<8x1xf32>
    %242 = vector.broadcast %241 : vector<8x1xf32> to vector<8x8xf32>
    %243 = arith.mulf %238, %242 : vector<8x8xf32>
    %244 = vector.extract_strided_slice %209 {offsets = [0, 8], sizes = [8, 8], strides = [1, 1]} : vector<8x32xf32> to vector<8x8xf32>
    %cst_80 = arith.constant dense<0.000000e+00> : vector<8x8xf32>
    %245 = tpu.matmul %243, %244, %cst_80 {dimension_numbers = #tpu.dot_dimension_numbers<[1], [0], [0], [1], [0, 0, 1, 1], [], []>} : vector<8x8xf32>, vector<8x8xf32>, vector<8x8xf32> -> vector<8x8xf32>
    %246 = vector.extract_strided_slice %2 {offsets = [8, 0], sizes = [8, 32], strides = [1, 1]} : vector<32x32xf32> to vector<8x32xf32>
    %cst_81 = arith.constant dense<0.000000e+00> : vector<8x32xf32>
    %247 = tpu.matmul %245, %246, %cst_81 {dimension_numbers = #tpu.dot_dimension_numbers<[1], [0], [0], [1], [0, 0, 1, 1], [], []>} : vector<8x8xf32>, vector<8x32xf32>, vector<8x32xf32> -> vector<8x32xf32>
    %248 = arith.addf %229, %247 : vector<8x32xf32>
    %249 = vector.extract_strided_slice %207 {offsets = [0, 16], sizes = [8, 8], strides = [1, 1]} : vector<8x32xf32> to vector<8x8xf32>
    %250 = vector.extract_strided_slice %208 {offsets = [0, 16], sizes = [8, 8], strides = [1, 1]} : vector<8x32xf32> to vector<8x8xf32>
    %251 = tpu.transpose %250, [1, 0] : vector<8x8xf32> -> vector<8x8xf32>
    %cst_82 = arith.constant dense<0.000000e+00> : vector<8x8xf32>
    %252 = tpu.matmul %249, %251, %cst_82 {dimension_numbers = #tpu.dot_dimension_numbers<[1], [0], [0], [1], [0, 0, 1, 1], [], []>} : vector<8x8xf32>, vector<8x8xf32>, vector<8x8xf32> -> vector<8x8xf32>
    %cst_83 = arith.constant dense<0xFF800000> : vector<8xf32>
    %253 = vector.multi_reduction <maximumf>, %252, %cst_83 [1] : vector<8x8xf32> to vector<8xf32>
    %254 = vector.shape_cast %253 : vector<8xf32> to vector<8x1xf32>
    %255 = vector.broadcast %254 : vector<8x1xf32> to vector<8x8xf32>
    %256 = arith.subf %252, %255 : vector<8x8xf32>
    %257 = math.exp %256 : vector<8x8xf32>
    %cst_84 = arith.constant dense<0.000000e+00> : vector<8xf32>
    %258 = vector.multi_reduction <add>, %257, %cst_84 [1] : vector<8x8xf32> to vector<8xf32>
    %259 = vector.shape_cast %258 : vector<8xf32> to vector<8x1xf32>
    %260 = tpu.reciprocal %259 {approx = true} : vector<8x1xf32> -> vector<8x1xf32>
    %261 = vector.broadcast %260 : vector<8x1xf32> to vector<8x8xf32>
    %262 = arith.mulf %257, %261 : vector<8x8xf32>
    %263 = vector.extract_strided_slice %209 {offsets = [0, 16], sizes = [8, 8], strides = [1, 1]} : vector<8x32xf32> to vector<8x8xf32>
    %cst_85 = arith.constant dense<0.000000e+00> : vector<8x8xf32>
    %264 = tpu.matmul %262, %263, %cst_85 {dimension_numbers = #tpu.dot_dimension_numbers<[1], [0], [0], [1], [0, 0, 1, 1], [], []>} : vector<8x8xf32>, vector<8x8xf32>, vector<8x8xf32> -> vector<8x8xf32>
    %265 = vector.extract_strided_slice %2 {offsets = [16, 0], sizes = [8, 32], strides = [1, 1]} : vector<32x32xf32> to vector<8x32xf32>
    %cst_86 = arith.constant dense<0.000000e+00> : vector<8x32xf32>
    %266 = tpu.matmul %264, %265, %cst_86 {dimension_numbers = #tpu.dot_dimension_numbers<[1], [0], [0], [1], [0, 0, 1, 1], [], []>} : vector<8x8xf32>, vector<8x32xf32>, vector<8x32xf32> -> vector<8x32xf32>
    %267 = arith.addf %248, %266 : vector<8x32xf32>
    %268 = vector.extract_strided_slice %207 {offsets = [0, 24], sizes = [8, 8], strides = [1, 1]} : vector<8x32xf32> to vector<8x8xf32>
    %269 = vector.extract_strided_slice %208 {offsets = [0, 24], sizes = [8, 8], strides = [1, 1]} : vector<8x32xf32> to vector<8x8xf32>
    %270 = tpu.transpose %269, [1, 0] : vector<8x8xf32> -> vector<8x8xf32>
    %cst_87 = arith.constant dense<0.000000e+00> : vector<8x8xf32>
    %271 = tpu.matmul %268, %270, %cst_87 {dimension_numbers = #tpu.dot_dimension_numbers<[1], [0], [0], [1], [0, 0, 1, 1], [], []>} : vector<8x8xf32>, vector<8x8xf32>, vector<8x8xf32> -> vector<8x8xf32>
    %cst_88 = arith.constant dense<0xFF800000> : vector<8xf32>
    %272 = vector.multi_reduction <maximumf>, %271, %cst_88 [1] : vector<8x8xf32> to vector<8xf32>
    %273 = vector.shape_cast %272 : vector<8xf32> to vector<8x1xf32>
    %274 = vector.broadcast %273 : vector<8x1xf32> to vector<8x8xf32>
    %275 = arith.subf %271, %274 : vector<8x8xf32>
    %276 = math.exp %275 : vector<8x8xf32>
    %cst_89 = arith.constant dense<0.000000e+00> : vector<8xf32>
    %277 = vector.multi_reduction <add>, %276, %cst_89 [1] : vector<8x8xf32> to vector<8xf32>
    %278 = vector.shape_cast %277 : vector<8xf32> to vector<8x1xf32>
    %279 = tpu.reciprocal %278 {approx = true} : vector<8x1xf32> -> vector<8x1xf32>
    %280 = vector.broadcast %279 : vector<8x1xf32> to vector<8x8xf32>
    %281 = arith.mulf %276, %280 : vector<8x8xf32>
    %282 = vector.extract_strided_slice %209 {offsets = [0, 24], sizes = [8, 8], strides = [1, 1]} : vector<8x32xf32> to vector<8x8xf32>
    %cst_90 = arith.constant dense<0.000000e+00> : vector<8x8xf32>
    %283 = tpu.matmul %281, %282, %cst_90 {dimension_numbers = #tpu.dot_dimension_numbers<[1], [0], [0], [1], [0, 0, 1, 1], [], []>} : vector<8x8xf32>, vector<8x8xf32>, vector<8x8xf32> -> vector<8x8xf32>
    %284 = vector.extract_strided_slice %2 {offsets = [24, 0], sizes = [8, 32], strides = [1, 1]} : vector<32x32xf32> to vector<8x32xf32>
    %cst_91 = arith.constant dense<0.000000e+00> : vector<8x32xf32>
    %285 = tpu.matmul %283, %284, %cst_91 {dimension_numbers = #tpu.dot_dimension_numbers<[1], [0], [0], [1], [0, 0, 1, 1], [], []>} : vector<8x8xf32>, vector<8x32xf32>, vector<8x32xf32> -> vector<8x32xf32>
    %286 = arith.addf %267, %285 : vector<8x32xf32>
    %287 = vector.shape_cast %8 : vector<32xf32> to vector<1x32xf32>
    %288 = vector.broadcast %287 : vector<1x32xf32> to vector<8x32xf32>
    %289 = arith.addf %286, %288 : vector<8x32xf32>
    %290 = arith.addf %200, %289 : vector<8x32xf32>
    %cst_92 = arith.constant dense<0.000000e+00> : vector<8xf32>
    %291 = vector.multi_reduction <add>, %290, %cst_92 [1] : vector<8x32xf32> to vector<8xf32>
    %292 = vector.shape_cast %291 : vector<8xf32> to vector<8x1xf32>
    %cst_93 = arith.constant 3.200000e+01 : f32
    %293 = vector.broadcast %cst_93 : f32 to vector<8x1xf32>
    %294 = arith.divf %292, %293 : vector<8x1xf32>
    %295 = vector.broadcast %294 : vector<8x1xf32> to vector<8x32xf32>
    %296 = arith.subf %290, %295 : vector<8x32xf32>
    %297 = arith.mulf %296, %296 : vector<8x32xf32>
    %cst_94 = arith.constant dense<0.000000e+00> : vector<8xf32>
    %298 = vector.multi_reduction <add>, %297, %cst_94 [1] : vector<8x32xf32> to vector<8xf32>
    %299 = vector.shape_cast %298 : vector<8xf32> to vector<8x1xf32>
    %cst_95 = arith.constant 3.200000e+01 : f32
    %300 = vector.broadcast %cst_95 : f32 to vector<8x1xf32>
    %301 = arith.divf %299, %300 : vector<8x1xf32>
    %302 = vector.broadcast %294 : vector<8x1xf32> to vector<8x32xf32>
    %303 = arith.subf %290, %302 : vector<8x32xf32>
    %cst_96 = arith.constant 9.99999974E-6 : f32
    %304 = vector.broadcast %cst_96 : f32 to vector<8x1xf32>
    %305 = arith.addf %301, %304 : vector<8x1xf32>
    %306 = math.rsqrt %305 : vector<8x1xf32>
    %307 = vector.broadcast %306 : vector<8x1xf32> to vector<8x32xf32>
    %308 = arith.mulf %303, %307 : vector<8x32xf32>
    %309 = vector.shape_cast %18 : vector<32xf32> to vector<1x32xf32>
    %310 = vector.broadcast %309 : vector<1x32xf32> to vector<8x32xf32>
    %311 = arith.mulf %308, %310 : vector<8x32xf32>
    %312 = vector.shape_cast %20 : vector<32xf32> to vector<1x32xf32>
    %313 = vector.broadcast %312 : vector<1x32xf32> to vector<8x32xf32>
    %314 = arith.addf %311, %313 : vector<8x32xf32>
    %cst_97 = arith.constant dense<0.000000e+00> : vector<8x64xf32>
    %315 = tpu.matmul %314, %3, %cst_97 {dimension_numbers = #tpu.dot_dimension_numbers<[1], [0], [0], [1], [0, 0, 1, 1], [], []>} : vector<8x32xf32>, vector<32x64xf32>, vector<8x64xf32> -> vector<8x64xf32>
    %316 = vector.shape_cast %10 : vector<64xf32> to vector<1x64xf32>
    %317 = vector.broadcast %316 : vector<1x64xf32> to vector<8x64xf32>
    %318 = arith.addf %315, %317 : vector<8x64xf32>
    %cst_98 = arith.constant 0.000000e+00 : f32
    %319 = vector.broadcast %cst_98 : f32 to vector<8x64xf32>
    %320 = arith.maximumf %318, %319 : vector<8x64xf32>
    %cst_99 = arith.constant dense<0.000000e+00> : vector<8x32xf32>
    %321 = tpu.matmul %320, %4, %cst_99 {dimension_numbers = #tpu.dot_dimension_numbers<[1], [0], [0], [1], [0, 0, 1, 1], [], []>} : vector<8x64xf32>, vector<64x32xf32>, vector<8x32xf32> -> vector<8x32xf32>
    %322 = vector.shape_cast %12 : vector<32xf32> to vector<1x32xf32>
    %323 = vector.broadcast %322 : vector<1x32xf32> to vector<8x32xf32>
    %324 = arith.addf %321, %323 : vector<8x32xf32>
    %325 = arith.addf %290, %324 : vector<8x32xf32>
    %c0_100 = arith.constant 0 : index
    %c1 = arith.constant 1 : index
    %c0_101 = arith.constant 0 : index
    %326 = vector.load %arg13[%c0_100, %c1, %c0_101] : memref<8x2x32xf32, #tpu.memory_space<vmem>>, vector<8x1x32xf32>
    %327 = vector.shape_cast %326 : vector<8x1x32xf32> to vector<8x32xf32>
    %328 = vector.shape_cast %325 : vector<8x32xf32> to vector<8x1x32xf32>
    tpu.vector_store %arg13[%c0_100, %c1, %c0_101], %328 {strides = array<i32>} : memref<8x2x32xf32, #tpu.memory_space<vmem>>, vector<8x1x32xf32>,
    return
  }
}

</mosaic_0001>

<bundles_post_ra>
// kernel: tpu_custom_call.1
= control target key start
LH: loop header
LB: loop body
LE: loop exit
PB: predicated region body
PF: predicated region fallthrough
CT: control target
= control target key end

     0   :  { %18 = vsyncpa [#allocation3], 0  ;;  %s4684_s0 = inlined_call_operand.hbm [shape: f32[8,2,32], index: 0, kind: input, shape index: {}]   ;;  %s4685_s1 = inlined_call_operand.vmem [shape: f32[32,96], index: 1, kind: input, shape index: {}]   ;;  %s4686_s2 = inlined_call_operand.vmem [shape: f32[1,96], index: 2, kind: input, shape index: {}]   ;;  %s4687_s3 = inlined_call_operand.vmem [shape: f32[32,32], index: 3, kind: input, shape index: {}]   ;;  %s4688_s4 = inlined_call_operand.vmem [shape: f32[1,32], index: 4, kind: input, shape index: {}]   ;;  %s4689_s5 = inlined_call_operand.vmem [shape: f32[32,64], index: 5, kind: input, shape index: {}]   ;;  %s4690_s6 = inlined_call_operand.vmem [shape: f32[1,64], index: 6, kind: input, shape index: {}]   ;;  %s4691_s7 = inlined_call_operand.vmem [shape: f32[64,32], index: 7, kind: input, shape index: {}]   ;;  %s4692_s8 = inlined_call_operand.vmem [shape: f32[1,32], index: 8, kind: input, shape index: {}]   ;;  %s4693_s9 = inlined_call_operand.vmem [shape: f32[1,32], index: 9, kind: input, shape index: {}]   ;;  %s4694_s10 = inlined_call_operand.vmem [shape: f32[1,32], index: 10, kind: input, shape index: {}]   ;;  %s4695_s11 = inlined_call_operand.vmem [shape: f32[1,32], index: 11, kind: input, shape index: {}]   ;;  %s4696_s12 = inlined_call_operand.vmem [shape: f32[1,32], index: 12, kind: input, shape index: {}]   ;;  %s4697_s13 = inlined_call_operand.hbm [shape: f32[8,2,32], index: 13, kind: output, shape index: {}]  }
   0x1   :  { %19 = vsyncpa [#allocation4], 0  ;;  %s3735_s25 = smov [#allocation2]   ;;  %s3687_s29 = scalar_lea.hbm %s4684_s0, 256 }
   0x2   :  { %s25_s26 = sshll.u32 %s3735_s25, 4  ;;  %p3688_p0 = scmp.ne.s32.totalorder %s4684_s0, %s3687_s29  ;;  %s26_s26 = int_to_ptr.vmem [resolvable:$true] %s25_s26 }
   0x3   :  { %p3691_p1 = scmp.lt.u32.totalorder %s3687_s29, %s4684_s0 }
   0x5   :  { %p3693_p2 = pnand %p3691_p1, %p3688_p0 }
   0x7   :  { %3696 = shalt.err (!%p3693_p2)
}
   0x8   :  { %s3697_s17 = scalar_lea.vmem %s26_s26, 256  ;;  %p3702_p4 = scmp.lt.s32.totalorder %s26_s26, %s26_s26 }
   0x9   :  { %p3698_p3 = scmp.ne.s32.totalorder %s26_s26, %s3697_s17  ;;  %p3703_p5 = scmp.lt.s32.totalorder %s3697_s17, %s3697_s17 }
   0xb   :  { %p3704_p6 = por %p3703_p5, %p3702_p4 }
   0xd   :  { %p3705_p7 = pnand %p3704_p6, %p3698_p3 }
   0xf   :  { %3708 = shalt.err (!%p3705_p7)
}
  0x10   :  { %s3736_s18 = smov 32   ;;  %s3737_s19 = smov 2  }
  0x11   :  { %31 = dma.hbm_to_vmem [thread:$0]  %s4684_s0, 256, %s26_s26, [#allocation3], %s3736_s18, %s3736_s18, %s3737_s19  }
  0x12   :  { %3731 = dma.done.wait [#allocation3], 256  }
  0x13   :  { %3732 = vsyncadd [#allocation3], 4294967040  ;;  %vm104_vm0 = vcmask 1041409   ;;  %v3838_v0 = vld [vmem:[#allocation2] sm:$0x3]  ;;  %vm107_vm1 = vcmask 1042434  }
  0x14   :  { %v3840_v1 = vld [vmem:[#allocation2 + $0x2] sm:$0x3]  ;;  %v3842_v2 = vld [vmem:[#allocation2 + $0x4] sm:$0x3]  ;;  %v3844_v3 = vld [vmem:[#allocation2 + $0x6] sm:$0x3] }
  0x15   :  { %v3846_v4 = vld [vmem:[#allocation2 + $0x8] sm:$0x3]  ;;  %v3848_v5 = vld [vmem:[#allocation2 + $0xa] sm:$0x3]  ;;  %v3850_v6 = vld [vmem:[#allocation2 + $0xc] sm:$0x3] }
  0x16   :  { %v103_v7 = vrot.slane %v3840_v1, 7  ;;  %v106_v8 = vrot.slane %v3842_v2, 6  ;;  %v3854_v9 = vld [vmem:[#allocation2 + $0xe] sm:$0x3]  ;;  %v109_v10 = vrot.slane %v3844_v3, 5  ;;  %vm110_vm2 = vcmask 1043459  }
  0x17   :  { %v112_v11 = vrot.slane %v3846_v4, 4  ;;  %vm113_vm3 = vcmask 1044484   ;;  %v115_v13 = vrot.slane %v3848_v5, 3  ;;  %vm116_vm4 = vcmask 1045509   ;;  %v67_v63 = vld [vmem:[%s4685_s1] sm:$0xff]  ;;  %s3741_s15 = smov 96  }
  0x18   :  { %v105_v12 = vsel %vm104_vm0, %v103_v7, %v3838_v0  ;;  %v118_v15 = vrot.slane %v3850_v6, 2  ;;  %vm119_vm5 = vcmask 1046534   ;;  %v121_v17 = vrot.slane %v3854_v9, 1  ;;  %s3742_s16 = smov 120   ;;  %s3743_s17 = smov 88  }
  0x19   :  { %v108_v14 = vsel %vm107_vm1, %v106_v8, %v105_v12  ;;  %vm122_vm6 = vcmask 1047559   ;;  %vm125_vm7 = vcmask 261120   ;;  %v68_v12 = vld [vmem:[%s4685_s1 + $0x8] sm:$0xff]  ;;  %vm3739_vm8 = vmmov 0   ;;  %s3745_s20 = smov 64   ;;  %s3746_s21 = smov 80  }
  0x1a   :  { %v111_v16 = vsel %vm110_vm2, %v109_v10, %v108_v14  ;;  %v69_v14 = vld [vmem:[%s4685_s1 + $0x10] sm:$0xff]  ;;  %vm348_vm9 = vcmask 64512   ;;  %s3747_s0 = smov 112   ;;  %s3748_s26 = smov 48   ;;  %vm1693_vm10 = vcmask 261121   ;;  %vm1676_vm11 = vcmask 253952  }
  0x1b   :  { %v114_v18 = vsel %vm113_vm3, %v112_v11, %v111_v16  ;;  %v3738_v16 = vmov 0.0|0.0   ;;  %s3749_s27 = smov 104   ;;  %s3750_s28 = smov 72   ;;  %vm1578_vm12 = vcmask 523264   ;;  %vm3217_vm13 = vcmask 254977  }
  0x1c   :  { %v117_v19 = vsel %vm116_vm4, %v115_v13, %v114_v18  ;;  %3577 = vmatprep.subr.bf16.mxu0 %v3738_v16  ;;  %v3910_v18 = vpack.c.bf16 %v68_v12, %v67_v63 }
  0x1d   :  { %v120_v20 = vsel %vm119_vm5, %v118_v15, %v117_v19  ;;  %v70_v19 = vld [vmem:[%s4685_s1 + $0x18] sm:$0xff] }
  0x1e   :  { %v123_v21 = vsel %vm122_vm6, %v121_v17, %v120_v20  ;;  %v3740_v20 = vmov 0.0   ;;  %3579 = vmatpush3.bf16.msra.mxu0 %v3910_v18 }
  0x1f   :  { %v126_v22 = vsel %vm125_vm7, %v123_v21, 0.0  ;;  %3383 = vmatprep.mubr.msk.f32.mxu0 %vm3739_vm8, %v3740_v20  ;;  %3391 = vmatprep.subr.mxu1 %v3740_v20  ;;  %v3921_v21 = vpack.c.bf16 %v70_v19, %v69_v14 }
  0x20   :  { %127 = vadd.xlane.f32.xlu0 %v126_v22  ;;  %3393 = vmatprep.mubr.msk.f32.mxu1 %vm3739_vm8, %v3740_v20 }
  0x21   :  { %3580 = vmatprep.subr.bf16.mxu0 %v3738_v16 }
  0x22   :  { %3582 = vmatpush3.bf16.msra.mxu0 %v3921_v21 }
  0x23   :  { %3386 = vmatprep.subr.mxu0 %v3740_v20 }
  0xad   :  { %v128_v23 = vpop.xlane.xlu0 %127 }
  0xae   :  { %v130_v24 = vmul.f32 0.03125, %v128_v23 }
  0xb0   :  { %v132_v25 = vrot.slane %v130_v24, 1  ;;  %v133_v26 = vrot.slane %v130_v24, 2  ;;  %v134_v27 = vrot.slane %v130_v24, 3  ;;  %v135_v28 = vrot.slane %v130_v24, 4 }
  0xb1   :  { %v136_v29 = vrot.slane %v130_v24, 5  ;;  %v137_v30 = vrot.slane %v130_v24, 6  ;;  %v138_v31 = vrot.slane %v130_v24, 7  ;;  %v147_v32 = vsub.f32 %v3838_v0, %v130_v24 }
  0xb2   :  { %v148_v33 = vsub.f32 %v3840_v1, %v132_v25  ;;  %v149_v34 = vsub.f32 %v3842_v2, %v133_v26  ;;  %v150_v35 = vsub.f32 %v3844_v3, %v134_v27  ;;  %v151_v36 = vsub.f32 %v3846_v4, %v135_v28  ;;  %v3929_v26 = vld [vmem:[%s4693_s9] ss:$0 sm:$0xff]  ;;  %s3751_s9 = smov 40  }
  0xb3   :  { %v152_v37 = vsub.f32 %v3848_v5, %v136_v29  ;;  %v153_v38 = vsub.f32 %v3850_v6, %v137_v30  ;;  %v154_v39 = vsub.f32 %v3854_v9, %v138_v31  ;;  %v155_v44 = vmul.f32 %v147_v32, %v147_v32 }
  0xb4   :  { %v156_v40 = vmul.f32 %v148_v33, %v148_v33  ;;  %v157_v41 = vmul.f32 %v149_v34, %v149_v34  ;;  %v158_v42 = vmul.f32 %v150_v35, %v150_v35  ;;  %v159_v43 = vmul.f32 %v151_v36, %v151_v36 }
  0xb5   :  { %v160_v45 = vmul.f32 %v152_v37, %v152_v37  ;;  %v161_v48 = vmul.f32 %v153_v38, %v153_v38  ;;  %v162_v49 = vmul.f32 %v154_v39, %v154_v39 }
  0xb6   :  { %v171_v46 = vrot.slane %v156_v40, 7  ;;  %v173_v47 = vrot.slane %v157_v41, 6  ;;  %v175_v51 = vrot.slane %v158_v42, 5  ;;  %v177_v53 = vrot.slane %v159_v43, 4 }
  0xb7   :  { %v179_v55 = vrot.slane %v160_v45, 3  ;;  %v181_v57 = vrot.slane %v161_v48, 2  ;;  %v183_v59 = vrot.slane %v162_v49, 1 }
  0xb8   :  { %v172_v50 = vsel %vm104_vm0, %v171_v46, %v155_v44 }
  0xb9   :  { %v174_v52 = vsel %vm107_vm1, %v173_v47, %v172_v50 }
  0xba   :  { %v176_v54 = vsel %vm110_vm2, %v175_v51, %v174_v52 }
  0xbb   :  { %v178_v56 = vsel %vm113_vm3, %v177_v53, %v176_v54 }
  0xbc   :  { %v180_v58 = vsel %vm116_vm4, %v179_v55, %v178_v56 }
  0xbd   :  { %v182_v60 = vsel %vm119_vm5, %v181_v57, %v180_v58 }
  0xbe   :  { %v184_v61 = vsel %vm122_vm6, %v183_v59, %v182_v60 }
  0xbf   :  { %v186_v62 = vsel %vm125_vm7, %v184_v61, 0.0 }
  0xc0   :  { %187 = vadd.xlane.f32.xlu0 %v186_v62 }
 0x14d   :  { %v188_v22 = vpop.xlane.xlu0 %187 }
 0x14e   :  { %v189_v23 = vmul.f32 0.03125, %v188_v22 }
 0x150   :  { %v190_v24 = vadd.f32 1e-05, %v189_v23 }
 0x152   :  { %3643 = vrsqrt.f32 %v190_v24 }
 0x15c   :  { %v3644_v25 = vpop.eup %3643 }
 0x15d   :  { %v193_v27 = vrot.slane %v3644_v25, 1  ;;  %v194_v28 = vrot.slane %v3644_v25, 2  ;;  %v195_v29 = vrot.slane %v3644_v25, 3  ;;  %v196_v30 = vrot.slane %v3644_v25, 4 }
 0x15e   :  { %v197_v31 = vrot.slane %v3644_v25, 5  ;;  %v198_v40 = vrot.slane %v3644_v25, 6  ;;  %v199_v41 = vrot.slane %v3644_v25, 7  ;;  %v208_v42 = vmul.f32 %v3644_v25, %v147_v32  ;;  %v3939_v32 = vld [vmem:[%s4694_s10] ss:$0 sm:$0xff] }
 0x15f   :  { %v209_v43 = vmul.f32 %v193_v27, %v148_v33  ;;  %v210_v44 = vmul.f32 %v194_v28, %v149_v34  ;;  %v211_v45 = vmul.f32 %v195_v29, %v150_v35  ;;  %v212_v46 = vmul.f32 %v196_v30, %v151_v36  ;;  %v3989_v29 = vld [vmem:[%s4686_s2] ss:$0 sm:$0xff]  ;;  %s3744_s2 = smov 56  }
 0x160   :  { %v213_v47 = vmul.f32 %v197_v31, %v152_v37  ;;  %v214_v48 = vmul.f32 %v198_v40, %v153_v38  ;;  %v215_v49 = vmul.f32 %v199_v41, %v154_v39  ;;  %v222_v50 = vmul.f32 %v3929_v26, %v208_v42 }
 0x161   :  { %v223_v51 = vmul.f32 %v3929_v26, %v209_v43  ;;  %v224_v52 = vmul.f32 %v3929_v26, %v210_v44  ;;  %v225_v53 = vmul.f32 %v3929_v26, %v211_v45  ;;  %v226_v54 = vmul.f32 %v3929_v26, %v212_v46 }
 0x162   :  { %v227_v33 = vmul.f32 %v3929_v26, %v213_v47  ;;  %v228_v34 = vmul.f32 %v3929_v26, %v214_v48  ;;  %v229_v35 = vmul.f32 %v3929_v26, %v215_v49  ;;  %v3957_v55 = vadd.f32 %v3939_v32, %v222_v50 }
 0x163   :  { %v3945_v36 = vadd.f32 %v3939_v32, %v223_v51  ;;  %v3948_v37 = vadd.f32 %v3939_v32, %v224_v52  ;;  %v3951_v38 = vadd.f32 %v3939_v32, %v225_v53  ;;  %v3954_v39 = vadd.f32 %v3939_v32, %v226_v54 }
 0x164   :  { %v3960_v56 = vadd.f32 %v3939_v32, %v227_v33  ;;  %v3965_v59 = vadd.f32 %v3939_v32, %v228_v34  ;;  %v3968_v60 = vadd.f32 %v3939_v32, %v229_v35 }
 0x165   :  { %v258_v57 = vrot.slane %v3945_v36, 7  ;;  %v260_v58 = vrot.slane %v3948_v37, 6  ;;  %v262_v62 = vrot.slane %v3951_v38, 5  ;;  %v264_v12 = vrot.slane %v3954_v39, 4 }
 0x166   :  { %v266_v19 = vrot.slane %v3960_v56, 3  ;;  %v268_v23 = vrot.slane %v3965_v59, 2  ;;  %v270_v25 = vrot.slane %v3968_v60, 1 }
 0x167   :  { %v259_v61 = vsel %vm104_vm0, %v258_v57, %v3957_v55 }
 0x168   :  { %v261_v63 = vsel %vm107_vm1, %v260_v58, %v259_v61 }
 0x169   :  { %v263_v14 = vsel %vm110_vm2, %v262_v62, %v261_v63  ;;  %v4029_v62 = vld [vmem:[%s4687_s3 + $0x8] sm:$0xff] }
 0x16a   :  { %v265_v22 = vsel %vm113_vm3, %v264_v12, %v263_v14 }
 0x16b   :  { %v267_v24 = vsel %vm116_vm4, %v266_v19, %v265_v22 }
 0x16c   :  { %v269_v27 = vsel %vm119_vm5, %v268_v23, %v267_v24 }
 0x16d   :  { %v271_v28 = vsel %vm122_vm6, %v270_v25, %v269_v27  ;;  %v4044_v27 = vld [vmem:[%s4687_s3] sm:$0xff] }
 0x16e   :  { %3384 = vmatmul.mubr.msk.f32.vlgmr.msra.gmra.mrb[0].mxu0 %vm125_vm7, %v271_v28 }
 0x16f   :  { %3388 = vmatprep.mubr.msk.f32.mxu0 %vm3739_vm8, %v3740_v20 }
 0x241   :  { %v340_v30 = vpop.f32.mrb[0].mxu0 }
 0x242   :  { %v3992_v31 = vadd.f32 %v3989_v29, %v340_v30  ;;  %v3385_v40 = vpop.f32.mrb[1].mxu0 }
 0x244   :  { %346 = vrot.lane.b32.xlu1 %v3992_v31, %s3741_s15  ;;  %v3997_v41 = vmul.f32 0.35355338, %v3992_v31 }
 0x246   :  { %511 = vrot.lane.b32.xlu0 %v3997_v41, %s3742_s16 }
 0x248   :  { %513 = vrot.lane.b32.xlu1 %v3992_v31, %s3743_s17 }
 0x2b6   :  { %v347_v42 = vpop.permute.xlu1 %346 }
 0x2b7   :  { %3387 = vmatpush3.xpose.msk.msra.mxu0 %vm348_vm9, %v347_v42 }
 0x2b8   :  { %3396 = vmatprep.subr.mxu0 %v3740_v20  ;;  %v512_v44 = vpop.permute.xlu0 %511 }
 0x2ba   :  { %v514_v43 = vpop.permute.xlu1 %513  ;;  %3389 = vmatmul.mubr.msk.f32.vlgmr.msra.gmra.mrb[2].mxu0 %vm348_vm9, %v3997_v41 }
 0x2bb   :  { %3397 = vmatpush3.xpose.msk.msra.mxu0 %vm348_vm9, %v514_v43  ;;  %3398 = vmatprep.mubr.msk.f32.mxu0 %vm3739_vm8, %v3740_v20 }
 0x2bc   :  { %3406 = vmatprep.subr.mxu0 %v3740_v20 }
 0x2be   :  { %3399 = vmatmul.mubr.msk.f32.vlgmr.msra.gmra.mrb[4].mxu0 %vm348_vm9, %v512_v44 }
 0x2bf   :  { %3408 = vmatprep.mubr.msk.f32.mxu0 %vm3739_vm8, %v3740_v20  ;;  %3407 = vmatpush3.msra.mxu0 %v4029_v62 }
 0x2c0   :  { %3416 = vmatprep.subr.mxu0 %v3740_v20 }
 0x38d   :  { %v420_v45 = vpop.f32.mrb[2].mxu0 }
 0x38e   :  { %v3390_v46 = vpop.f32.mrb[3].mxu0  ;;  %v424_v47 = vsel %vm348_vm9, %v420_v45, -inf }
 0x38f   :  { %425 = vmax.xlane.f32.xlu1 %v424_v47 }
 0x391   :  { %v585_v48 = vpop.f32.mrb[4].mxu0 }
 0x392   :  { %v3400_v49 = vpop.f32.mrb[5].mxu0  ;;  %v589_v50 = vsel %vm348_vm9, %v585_v48, -inf }
 0x393   :  { %590 = vmax.xlane.f32.xlu0 %v589_v50 }
 0x3a9   :  { %600 = vrot.lane.b32.xlu0 %v3992_v31, %s3744_s2 }
 0x41c   :  { %v426_v51 = vpop.xlane.xlu1 %425 }
 0x41d   :  { %v427_v52 = vsub.f32 %v420_v45, %v426_v51 }
 0x41f   :  { %v428_v53 = vmul.f32 1.442695, %v427_v52 }
 0x420   :  { %v591_v54 = vpop.xlane.xlu0 %590 }
 0x421   :  { %3645 = vpow2.f32 %v428_v53  ;;  %v592_v33 = vsub.f32 %v585_v48, %v591_v54 }
 0x423   :  { %v593_v34 = vmul.f32 1.442695, %v592_v33 }
 0x424   :  { %v601_v23 = vpop.permute.xlu0 %600 }
 0x425   :  { %3647 = vpow2.f32 %v593_v34 }
 0x42b   :  { %v3646_v35 = vpop.eup %3645 }
 0x42c   :  { %v430_v57 = vsel %vm348_vm9, %v3646_v35, 0.0 }
 0x42d   :  { %431 = vadd.xlane.f32.xlu1 %v430_v57 }
 0x42f   :  { %v3648_v58 = vpop.eup %3647 }
 0x430   :  { %v595_v61 = vsel %vm348_vm9, %v3648_v58, 0.0 }
 0x431   :  { %596 = vadd.xlane.f32.xlu1 %v595_v61 }
 0x442   :  { %435 = vrot.lane.b32.xlu1 %v3992_v31, %s3745_s20 }
 0x446   :  { %824 = vrot.lane.b32.xlu1 %v3992_v31, %s3746_s21 }
 0x44a   :  { %822 = vrot.lane.b32.xlu1 %v3997_v41, %s3747_s0 }
 0x4ba   :  { %v432_v63 = vpop.xlane.xlu1 %431 }
 0x4bb   :  { %3649 = vrcp.f32 %v432_v63 }
 0x4be   :  { %v597_v12 = vpop.xlane.xlu1 %596 }
 0x4bf   :  { %3651 = vrcp.f32 %v597_v12 }
 0x4c2   :  { %v436_v14 = vpop.permute.xlu1 %435 }
 0x4c3   :  { %3392 = vmatpush3.msra.mxu1 %v436_v14  ;;  %v4079_v14 = vld [vmem:[%s4687_s3 + $0x10] sm:$0xff] }
 0x4c4   :  { %3401 = vmatprep.subr.mxu1 %v3740_v20 }
 0x4c5   :  { %v3650_v19 = vpop.eup %3649 }
 0x4c6   :  { %v434_v22 = vmul.f32 %v3650_v19, %v3646_v35  ;;  %v825_v40 = vpop.permute.xlu1 %824 }
 0x4c8   :  { %3394 = vmatmul.mubr.msk.f32.vlgmr.msra.gmra.mrb[0].mxu1 %vm348_vm9, %v434_v22 }
 0x4c9   :  { %v3652_v24 = vpop.eup %3651  ;;  %3402 = vmatpush3.msra.mxu1 %v601_v23  ;;  %3403 = vmatprep.mubr.msk.f32.mxu1 %vm3739_vm8, %v3740_v20 }
 0x4ca   :  { %v599_v25 = vmul.f32 %v3652_v24, %v3648_v58  ;;  %3411 = vmatprep.subr.mxu1 %v3740_v20  ;;  %v823_v44 = vpop.permute.xlu1 %822 }
 0x4cc   :  { %3404 = vmatmul.mubr.msk.f32.vlgmr.msra.gmra.mrb[2].mxu1 %vm348_vm9, %v599_v25 }
 0x4cd   :  { %3413 = vmatprep.mubr.msk.f32.mxu1 %vm3739_vm8, %v3740_v20  ;;  %3412 = vmatpush3.msra.mxu1 %v4044_v27 }
 0x4ce   :  { %3421 = vmatprep.subr.mxu1 %v3740_v20 }
 0x59b   :  { %v507_v28 = vpop.f32.mrb[0].mxu1 }
 0x59c   :  { %v3395_v30 = vpop.f32.mrb[1].mxu1  ;;  %3414 = vmatmul.mubr.msk.f32.vlgmr.msra.gmra.mrb[4].mxu1 %vm348_vm9, %v507_v28 }
 0x59d   :  { %3423 = vmatprep.mubr.msk.f32.mxu1 %vm3739_vm8, %v3740_v20 }
 0x59f   :  { %v672_v42 = vpop.f32.mrb[2].mxu1 }
 0x5a0   :  { %v3405_v43 = vpop.f32.mrb[3].mxu1  ;;  %3409 = vmatmul.mubr.msk.f32.vlgmr.msra.gmra.mrb[6].mxu0 %vm348_vm9, %v672_v42 }
 0x5a1   :  { %3417 = vmatpush3.xpose.msk.msra.mxu0 %vm348_vm9, %v825_v40  ;;  %3418 = vmatprep.mubr.msk.f32.mxu0 %vm3739_vm8, %v3740_v20 }
 0x5a2   :  { %3426 = vmatprep.subr.mxu0 %v3740_v20 }
 0x5a4   :  { %3419 = vmatmul.mubr.msk.f32.vlgmr.msra.gmra.mrb[8].mxu0 %vm348_vm9, %v823_v44  ;;  %v4093_v44 = vld [vmem:[%s4687_s3 + $0x18] sm:$0xff] }
 0x5a5   :  { %3428 = vmatprep.mubr.msk.f32.mxu0 %vm3739_vm8, %v3740_v20  ;;  %3427 = vmatpush3.msra.mxu0 %v4079_v14 }
 0x5a6   :  { %3436 = vmatprep.subr.mxu0 %v3740_v20 }
 0x66f   :  { %v818_v45 = vpop.f32.mrb[4].mxu1 }
 0x670   :  { %v3415_v46 = vpop.f32.mrb[5].mxu1 }
 0x673   :  { %v745_v47 = vpop.f32.mrb[6].mxu0 }
 0x674   :  { %v819_v48 = vadd.f32 %v818_v45, %v745_v47  ;;  %v3410_v49 = vpop.f32.mrb[7].mxu0 }
 0x677   :  { %v896_v50 = vpop.f32.mrb[8].mxu0 }
 0x678   :  { %v3420_v51 = vpop.f32.mrb[9].mxu0  ;;  %v900_v52 = vsel %vm348_vm9, %v896_v50, -inf }
 0x679   :  { %901 = vmax.xlane.f32.xlu1 %v900_v52 }
 0x68a   :  { %911 = vrot.lane.b32.xlu1 %v3992_v31, %s3748_s26 }
 0x68e   :  { %1061 = vrot.lane.b32.xlu1 %v3997_v41, %s3749_s27 }
 0x706   :  { %v902_v53 = vpop.xlane.xlu1 %901 }
 0x707   :  { %v903_v54 = vsub.f32 %v896_v50, %v902_v53 }
 0x709   :  { %v904_v33 = vmul.f32 1.442695, %v903_v54 }
 0x70a   :  { %v912_v34 = vpop.permute.xlu1 %911 }
 0x70b   :  { %3653 = vpow2.f32 %v904_v33  ;;  %3422 = vmatpush3.msra.mxu1 %v912_v34 }
 0x70c   :  { %3431 = vmatprep.subr.mxu1 %v3740_v20 }
 0x70e   :  { %v1062_v12 = vpop.permute.xlu1 %1061 }
 0x715   :  { %v3654_v35 = vpop.eup %3653 }
 0x716   :  { %v906_v57 = vsel %vm348_vm9, %v3654_v35, 0.0 }
 0x717   :  { %907 = vadd.xlane.f32.xlu0 %v906_v57 }
 0x72d   :  { %1063 = vrot.lane.b32.xlu0 %v3992_v31, %s3750_s28 }
 0x7a4   :  { %v908_v58 = vpop.xlane.xlu0 %907 }
 0x7a5   :  { %3655 = vrcp.f32 %v908_v58 }
 0x7a8   :  { %v1064_v63 = vpop.permute.xlu0 %1063 }
 0x7af   :  { %v3656_v61 = vpop.eup %3655 }
 0x7b0   :  { %v910_v41 = vmul.f32 %v3656_v61, %v3654_v35  ;;  %v1685_v35 = vsel %vm107_vm1, %v103_v7, %v3838_v0 }
 0x7b1   :  { %v1686_v58 = vsel %vm110_vm2, %v106_v8, %v1685_v35 }
 0x7b2   :  { %3424 = vmatmul.mubr.msk.f32.vlgmr.msra.gmra.mrb[6].mxu1 %vm348_vm9, %v910_v41  ;;  %v1687_v8 = vsel %vm113_vm3, %v109_v10, %v1686_v58 }
 0x7b3   :  { %3432 = vmatpush3.xpose.msk.msra.mxu1 %vm348_vm9, %v1064_v63  ;;  %3433 = vmatprep.mubr.msk.f32.mxu1 %vm3739_vm8, %v3740_v20 }
 0x7b4   :  { %3441 = vmatprep.subr.mxu1 %v3740_v20 }
 0x7b6   :  { %3434 = vmatmul.mubr.msk.f32.vlgmr.msra.gmra.mrb[8].mxu1 %vm348_vm9, %v1062_v12 }
 0x7b7   :  { %3443 = vmatprep.mubr.msk.f32.mxu1 %vm3739_vm8, %v3740_v20  ;;  %3442 = vmatpush3.msra.mxu1 %v4093_v44 }
 0x7b8   :  { %3589 = vmatprep.subr.bf16.mxu1 %v3738_v16 }
 0x885   :  { %v983_v19 = vpop.f32.mrb[6].mxu1 }
 0x886   :  { %v3425_v22 = vpop.f32.mrb[7].mxu1  ;;  %3429 = vmatmul.mubr.msk.f32.vlgmr.msra.gmra.mrb[10].mxu0 %vm348_vm9, %v983_v19 }
 0x887   :  { %3438 = vmatprep.mubr.msk.f32.mxu0 %vm3739_vm8, %v3740_v20 }
 0x889   :  { %v1135_v23 = vpop.f32.mrb[8].mxu1 }
 0x88a   :  { %v3435_v24 = vpop.f32.mrb[9].mxu1  ;;  %v1139_v25 = vsel %vm348_vm9, %v1135_v23, -inf }
 0x88b   :  { %1140 = vmax.xlane.f32.xlu1 %v1139_v25 }
 0x918   :  { %v1141_v28 = vpop.xlane.xlu1 %1140 }
 0x919   :  { %v1142_v30 = vsub.f32 %v1135_v23, %v1141_v28 }
 0x91b   :  { %v1143_v40 = vmul.f32 1.442695, %v1142_v30 }
 0x91d   :  { %3657 = vpow2.f32 %v1143_v40 }
 0x927   :  { %v3658_v42 = vpop.eup %3657 }
 0x928   :  { %v1145_v43 = vsel %vm348_vm9, %v3658_v42, 0.0 }
 0x929   :  { %1146 = vadd.xlane.f32.xlu0 %v1145_v43 }
 0x93f   :  { %1150 = vrot.lane.b32.xlu0 %v3992_v31, %s3751_s9 }
 0x959   :  { %v1056_v45 = vpop.f32.mrb[10].mxu0 }
 0x95a   :  { %v1060_v46 = vadd.f32 %v1056_v45, %v819_v48  ;;  %v3430_v47 = vpop.f32.mrb[11].mxu0  ;;  %v4107_v48 = vld [vmem:[%s4688_s4] ss:$0 sm:$0xff] }
 0x9b6   :  { %v1147_v49 = vpop.xlane.xlu0 %1146 }
 0x9b7   :  { %3659 = vrcp.f32 %v1147_v49 }
 0x9ba   :  { %v1151_v50 = vpop.permute.xlu0 %1150 }
 0x9bb   :  { %3437 = vmatpush3.msra.mxu0 %v1151_v50 }
 0x9bc   :  { %3583 = vmatprep.subr.bf16.mxu0 %v3738_v16 }
 0x9c1   :  { %v3660_v51 = vpop.eup %3659 }
 0x9c2   :  { %v1149_v31 = vmul.f32 %v3660_v51, %v3658_v42 }
 0x9c4   :  { %3439 = vmatmul.mubr.msk.f32.vlgmr.msra.gmra.mrb[12].mxu0 %vm348_vm9, %v1149_v31 }
 0x9c5   :  { %3454 = vmatprep.mubr.msk.f32.mxu0 %vm3739_vm8, %v3740_v20 }
 0xa97   :  { %v1222_v52 = vpop.f32.mrb[12].mxu0 }
 0xa98   :  { %v3440_v53 = vpop.f32.mrb[13].mxu0  ;;  %3444 = vmatmul.mubr.msk.f32.vlgmr.msra.gmra.mrb[10].mxu1 %vm348_vm9, %v1222_v52 }
 0xa99   :  { %3473 = vmatprep.mubr.msk.f32.mxu1 %vm3739_vm8, %v3740_v20 }
 0xb6b   :  { %v1295_v54 = vpop.f32.mrb[10].mxu1 }
 0xb6c   :  { %v1299_v33 = vadd.f32 %v1295_v54, %v1060_v46  ;;  %v3445_v34 = vpop.f32.mrb[11].mxu1 }
 0xb6e   :  { %v1306_v57 = vadd.f32 %v4107_v48, %v1299_v33 }
 0xb70   :  { %v1308_v61 = vrot.slane %v1306_v57, 1  ;;  %v1309_v41 = vrot.slane %v1306_v57, 2  ;;  %v1310_v63 = vrot.slane %v1306_v57, 3  ;;  %v1311_v12 = vrot.slane %v1306_v57, 4 }
 0xb71   :  { %v1312_v19 = vrot.slane %v1306_v57, 5  ;;  %v1313_v22 = vrot.slane %v1306_v57, 6  ;;  %v1314_v23 = vrot.slane %v1306_v57, 7  ;;  %v4133_v30 = vadd.f32 %v1306_v57, %v3957_v55 }
 0xb72   :  { %v4118_v24 = vadd.f32 %v1308_v61, %v3945_v36  ;;  %v4121_v25 = vadd.f32 %v1309_v41, %v3948_v37  ;;  %v4124_v7 = vadd.f32 %v1310_v63, %v3951_v38  ;;  %v4127_v28 = vadd.f32 %v1311_v12, %v3954_v39 }
 0xb73   :  { %v4136_v40 = vadd.f32 %v1312_v19, %v3960_v56  ;;  %v4141_v38 = vadd.f32 %v1313_v22, %v3965_v59  ;;  %v4144_v39 = vadd.f32 %v1314_v23, %v3968_v60  ;;  %v1688_v55 = vsel %vm116_vm4, %v112_v11, %v1687_v8 }
 0xb74   :  { %v1339_v36 = vrot.slane %v4118_v24, 7  ;;  %v1341_v37 = vrot.slane %v4121_v25, 6  ;;  %v1343_v10 = vrot.slane %v4124_v7, 5  ;;  %v1345_v43 = vrot.slane %v4127_v28, 4 }
 0xb75   :  { %v1347_v59 = vrot.slane %v4136_v40, 3  ;;  %v1349_v46 = vrot.slane %v4141_v38, 2  ;;  %v1689_v47 = vsel %vm119_vm5, %v115_v13, %v1688_v55  ;;  %v1351_v11 = vrot.slane %v4144_v39, 1 }
 0xb76   :  { %v1340_v42 = vsel %vm104_vm0, %v1339_v36, %v4133_v30  ;;  %v1690_v31 = vsel %vm122_vm6, %v118_v15, %v1689_v47  ;;  %v1697_v13 = vsel %vm1676_vm11, %v121_v17, 0.0 }
 0xb77   :  { %v1342_v56 = vsel %vm107_vm1, %v1341_v37, %v1340_v42  ;;  %v1694_v53 = vsel %vm1693_vm10, %v1690_v31, 0.0 }
 0xb78   :  { %v1344_v45 = vsel %vm110_vm2, %v1343_v10, %v1342_v56 }
 0xb79   :  { %v1346_v60 = vsel %vm113_vm3, %v1345_v43, %v1344_v45 }
 0xb7a   :  { %v1348_v49 = vsel %vm116_vm4, %v1347_v59, %v1346_v60 }
 0xb7b   :  { %v1350_v50 = vsel %vm119_vm5, %v1349_v46, %v1348_v49 }
 0xb7c   :  { %v1352_v51 = vsel %vm122_vm6, %v1351_v11, %v1350_v50 }
 0xb7d   :  { %v1354_v52 = vsel %vm125_vm7, %v1352_v51, 0.0 }
 0xb7e   :  { %1355 = vadd.xlane.f32.xlu1 %v1354_v52 }
 0xb82   :  { %1695 = vadd.xlane.f32.xlu1 %v1694_v53 }
 0xb86   :  { %1698 = vadd.xlane.f32.xlu1 %v1697_v13 }
 0xc0b   :  { %v1356_v54 = vpop.xlane.xlu1 %1355 }
 0xc0c   :  { %v1357_v33 = vmul.f32 0.03125, %v1356_v54 }
 0xc0e   :  { %v1359_v34 = vrot.slane %v1357_v33, 1  ;;  %v1360_v35 = vrot.slane %v1357_v33, 2  ;;  %v1361_v57 = vrot.slane %v1357_v33, 3  ;;  %v1362_v58 = vrot.slane %v1357_v33, 4 }
 0xc0f   :  { %v1696_v15 = vpop.xlane.xlu1 %1695  ;;  %v1363_v61 = vrot.slane %v1357_v33, 5  ;;  %v1364_v41 = vrot.slane %v1357_v33, 6  ;;  %v1365_v63 = vrot.slane %v1357_v33, 7  ;;  %v4174_v12 = vsub.f32 %v4133_v30, %v1357_v33 }
 0xc10   :  { %v1700_v19 = vmul.f32 0.03125, %v1696_v15  ;;  %v4177_v22 = vsub.f32 %v4118_v24, %v1359_v34  ;;  %v4180_v17 = vsub.f32 %v4121_v25, %v1360_v35  ;;  %v4183_v23 = vsub.f32 %v4124_v7, %v1361_v57 }
 0xc11   :  { %v4186_v8 = vsub.f32 %v4127_v28, %v1362_v58  ;;  %v4189_v36 = vsub.f32 %v4136_v40, %v1363_v61  ;;  %v4192_v37 = vsub.f32 %v4141_v38, %v1364_v41  ;;  %v4195_v42 = vsub.f32 %v4144_v39, %v1365_v63 }
 0xc12   :  { %v1382_v10 = vmul.f32 %v4174_v12, %v4174_v12  ;;  %v1383_v55 = vmul.f32 %v4177_v22, %v4177_v22  ;;  %v1384_v56 = vmul.f32 %v4180_v17, %v4180_v17  ;;  %v1385_v43 = vmul.f32 %v4183_v23, %v4183_v23 }
 0xc13   :  { %v1699_v45 = vpop.xlane.xlu1 %1698  ;;  %v1386_v59 = vmul.f32 %v4186_v8, %v4186_v8  ;;  %v1387_v60 = vmul.f32 %v4189_v36, %v4189_v36  ;;  %v1388_v46 = vmul.f32 %v4192_v37, %v4192_v37  ;;  %v1389_v47 = vmul.f32 %v4195_v42, %v4195_v42 }
 0xc14   :  { %v1701_v49 = vmul.f32 0.03125, %v1699_v45  ;;  %v1398_v11 = vrot.slane %v1383_v55, 7  ;;  %v1400_v50 = vrot.slane %v1384_v56, 6  ;;  %v1402_v51 = vrot.slane %v1385_v43, 5 }
 0xc15   :  { %v1404_v31 = vrot.slane %v1386_v59, 4  ;;  %v1406_v52 = vrot.slane %v1387_v60, 3  ;;  %v1408_v53 = vrot.slane %v1388_v46, 2  ;;  %v1410_v13 = vrot.slane %v1389_v47, 1 }
 0xc16   :  { %v1710_v54 = vrot.slane %v1701_v49, 7  ;;  %v1399_v33 = vsel %vm104_vm0, %v1398_v11, %v1382_v10  ;;  %v1704_v34 = vrot.slane %v1700_v19, 1  ;;  %v1705_v35 = vrot.slane %v1700_v19, 2 }
 0xc17   :  { %v1401_v57 = vsel %vm107_vm1, %v1400_v50, %v1399_v33  ;;  %v1706_v58 = vrot.slane %v1700_v19, 3  ;;  %v1707_v15 = vrot.slane %v1700_v19, 4  ;;  %v1708_v61 = vrot.slane %v1700_v19, 5 }
 0xc18   :  { %v4216_v41 = vsub.f32 %v3854_v9, %v1710_v54  ;;  %v1403_v63 = vsel %vm110_vm2, %v1402_v51, %v1401_v57  ;;  %v1709_v55 = vrot.slane %v1700_v19, 6  ;;  %v4220_v56 = vsub.f32 %v3838_v0, %v1700_v19 }
 0xc19   :  { %v1405_v43 = vsel %vm113_vm3, %v1404_v31, %v1403_v63  ;;  %v4224_v10 = vsub.f32 %v3840_v1, %v1704_v34  ;;  %v4227_v45 = vsub.f32 %v3842_v2, %v1705_v35  ;;  %v4230_v59 = vsub.f32 %v3844_v3, %v1706_v58 }
 0xc1a   :  { %v1407_v9 = vsel %vm116_vm4, %v1406_v52, %v1405_v43  ;;  %v1734_v60 = vmul.f32 %v4216_v41, %v4216_v41  ;;  %v4236_v46 = vsub.f32 %v3846_v4, %v1707_v15  ;;  %v4239_v0 = vsub.f32 %v3848_v5, %v1708_v61  ;;  %v75_v43 = vld [vmem:[%s4689_s5] sm:$0xff] }
 0xc1b   :  { %v1409_v1 = vsel %vm119_vm5, %v1408_v53, %v1407_v9  ;;  %v4243_v19 = vsub.f32 %v3850_v6, %v1709_v55  ;;  %v1727_v2 = vmul.f32 %v4220_v56, %v4220_v56  ;;  %v1728_v3 = vmul.f32 %v4224_v10, %v4224_v10  ;;  %v76_v9 = vld [vmem:[%s4689_s5 + $0x8] sm:$0xff] }
 0xc1c   :  { %v1411_v47 = vsel %vm122_vm6, %v1410_v13, %v1409_v1  ;;  %v1755_v49 = vrot.slane %v1734_v60, 1  ;;  %v1729_v4 = vmul.f32 %v4227_v45, %v4227_v45  ;;  %v1730_v5 = vmul.f32 %v4230_v59, %v4230_v59  ;;  %v77_v60 = vld [vmem:[%s4689_s5 + $0x10] sm:$0xff] }
 0xc1d   :  { %v1413_v11 = vsel %vm125_vm7, %v1411_v47, 0.0  ;;  %v1731_v6 = vmul.f32 %v4236_v46, %v4236_v46  ;;  %v1732_v50 = vmul.f32 %v4239_v0, %v4239_v0  ;;  %v1733_v51 = vmul.f32 %v4243_v19, %v4243_v19  ;;  %v79_v47 = vld [vmem:[%s4691_s7] sm:$0xff] }
 0xc1e   :  { %1414 = vadd.xlane.f32.xlu1 %v1413_v11  ;;  %v1761_v31 = vsel %vm1676_vm11, %v1755_v49, 0.0  ;;  %v1743_v52 = vrot.slane %v1728_v3, 7  ;;  %v1745_v53 = vrot.slane %v1729_v4, 6  ;;  %v1747_v13 = vrot.slane %v1730_v5, 5  ;;  %v80_v49 = vld [vmem:[%s4691_s7 + $0x8] sm:$0xff]  ;;  %v81_v4 = vld [vmem:[%s4691_s7 + $0x10] sm:$0xff] }
 0xc1f   :  { %1762 = vadd.xlane.f32.xlu0 %v1761_v31  ;;  %v1749_v54 = vrot.slane %v1731_v6, 4  ;;  %v1751_v34 = vrot.slane %v1732_v50, 3  ;;  %v1753_v57 = vrot.slane %v1733_v51, 2  ;;  %v4278_v1 = vpack.c.bf16 %v76_v9, %v75_v43  ;;  %v82_v11 = vld [vmem:[%s4691_s7 + $0x18] sm:$0xff]  ;;  %v83_v50 = vld [vmem:[%s4691_s7 + $0x20] sm:$0xff]  ;;  %v84_v51 = vld [vmem:[%s4691_s7 + $0x28] sm:$0xff] }
 0xc20   :  { %v1744_v33 = vsel %vm107_vm1, %v1743_v52, %v1727_v2  ;;  %v78_v2 = vld [vmem:[%s4689_s5 + $0x18] sm:$0xff]  ;;  %v4298_v5 = vpack.c.bf16 %v80_v49, %v79_v47  ;;  %v4304_v6 = vpack.c.bf16 %v82_v11, %v81_v4  ;;  %v4314_v31 = vpack.c.bf16 %v84_v51, %v83_v50 }
 0xc21   :  { %v1746_v35 = vsel %vm110_vm2, %v1745_v53, %v1744_v33  ;;  %3585 = vmatpush3.bf16.msra.mxu0 %v4278_v1  ;;  %v4284_v3 = vpack.c.bf16 %v78_v2, %v77_v60  ;;  %v4322_v2 = vld [vmem:[%s4695_s11] ss:$0 sm:$0xff] }
 0xc22   :  { %v1748_v58 = vsel %vm113_vm3, %v1747_v13, %v1746_v35  ;;  %3586 = vmatprep.subr.bf16.mxu0 %v3738_v16  ;;  %3591 = vmatpush3.bf16.msra.mxu1 %v4298_v5 }
 0xc23   :  { %v1750_v15 = vsel %vm116_vm4, %v1749_v54, %v1748_v58  ;;  %3592 = vmatprep.subr.bf16.mxu1 %v3738_v16 }
 0xc24   :  { %v1752_v61 = vsel %vm119_vm5, %v1751_v34, %v1750_v15 }
 0xc25   :  { %v1754_v63 = vsel %vm122_vm6, %v1753_v57, %v1752_v61  ;;  %3588 = vmatpush3.bf16.msra.mxu0 %v4284_v3 }
 0xc26   :  { %v1758_v55 = vsel %vm1693_vm10, %v1754_v63, 0.0  ;;  %3601 = vmatprep.subr.bf16.mxu0 %v3738_v16  ;;  %3594 = vmatpush3.bf16.msra.mxu1 %v4304_v6 }
 0xc27   :  { %1759 = vadd.xlane.f32.xlu1 %v1758_v55  ;;  %3595 = vmatprep.subr.bf16.mxu1 %v3738_v16 }
 0xc2a   :  { %3597 = vmatpush3.bf16.msra.mxu1 %v4314_v31 }
 0xc2b   :  { %3598 = vmatprep.subr.bf16.mxu1 %v3738_v16 }
 0xcab   :  { %v1415_v52 = vpop.xlane.xlu1 %1414 }
 0xcac   :  { %v1416_v53 = vmul.f32 0.03125, %v1415_v52  ;;  %v1763_v13 = vpop.xlane.xlu0 %1762 }
 0xcad   :  { %v1765_v54 = vmul.f32 0.03125, %v1763_v13 }
 0xcae   :  { %v1417_v33 = vadd.f32 1e-05, %v1416_v53 }
 0xcaf   :  { %v1767_v34 = vadd.f32 1e-05, %v1765_v54 }
 0xcb0   :  { %3661 = vrsqrt.f32 %v1417_v33 }
 0xcb1   :  { %3663 = vrsqrt.f32 %v1767_v34  ;;  %v4335_v34 = vld [vmem:[%s4696_s12] ss:$0 sm:$0xff] }
 0xcb4   :  { %v1760_v35 = vpop.xlane.xlu1 %1759 }
 0xcb5   :  { %v1764_v57 = vmul.f32 0.03125, %v1760_v35 }
 0xcb7   :  { %v1766_v58 = vadd.f32 1e-05, %v1764_v57 }
 0xcb9   :  { %3665 = vrsqrt.f32 %v1766_v58 }
 0xcba   :  { %v3662_v15 = vpop.eup %3661 }
 0xcbb   :  { %v3664_v61 = vpop.eup %3663  ;;  %v1420_v63 = vrot.slane %v3662_v15, 1  ;;  %v1421_v55 = vrot.slane %v3662_v15, 2  ;;  %v1422_v43 = vrot.slane %v3662_v15, 3  ;;  %v1423_v9 = vrot.slane %v3662_v15, 4 }
 0xcbc   :  { %v1778_v60 = vrot.slane %v3664_v61, 7  ;;  %v1424_v47 = vrot.slane %v3662_v15, 5  ;;  %v1425_v49 = vrot.slane %v3662_v15, 6  ;;  %v1426_v4 = vrot.slane %v3662_v15, 7 }
 0xcbd   :  { %v1435_v11 = vmul.f32 %v3662_v15, %v4174_v12  ;;  %v1436_v50 = vmul.f32 %v1420_v63, %v4177_v22  ;;  %v1437_v51 = vmul.f32 %v1421_v55, %v4180_v17  ;;  %v1438_v52 = vmul.f32 %v1422_v43, %v4183_v23 }
 0xcbe   :  { %v1794_v53 = vmul.f32 %v1778_v60, %v4216_v41  ;;  %v1439_v13 = vmul.f32 %v1423_v9, %v4186_v8  ;;  %v1440_v54 = vmul.f32 %v1424_v47, %v4189_v36  ;;  %v1441_v33 = vmul.f32 %v1425_v49, %v4192_v37 }
 0xcbf   :  { %v1442_v12 = vmul.f32 %v1426_v4, %v4195_v42  ;;  %v1449_v22 = vmul.f32 %v4322_v2, %v1435_v11  ;;  %v1450_v17 = vmul.f32 %v4322_v2, %v1436_v50  ;;  %v1451_v23 = vmul.f32 %v4322_v2, %v1437_v51 }
 0xcc0   :  { %v1452_v41 = vmul.f32 %v4322_v2, %v1438_v52  ;;  %v1453_v8 = vmul.f32 %v4322_v2, %v1439_v13  ;;  %v1454_v36 = vmul.f32 %v4322_v2, %v1440_v54  ;;  %v1802_v37 = vmul.f32 %v3929_v26, %v1794_v53 }
 0xcc1   :  { %v1455_v35 = vmul.f32 %v4322_v2, %v1441_v33  ;;  %v1456_v57 = vmul.f32 %v4322_v2, %v1442_v12  ;;  %v1464_v42 = vadd.f32 %v4335_v34, %v1450_v17  ;;  %v1463_v58 = vadd.f32 %v4335_v34, %v1449_v22 }
 0xcc2   :  { %v1465_v15 = vadd.f32 %v4335_v34, %v1451_v23  ;;  %v1466_v61 = vadd.f32 %v4335_v34, %v1452_v41  ;;  %v1467_v63 = vadd.f32 %v4335_v34, %v1453_v8  ;;  %v1468_v43 = vadd.f32 %v4335_v34, %v1454_v36 }
 0xcc3   :  { %v3666_v55 = vpop.eup %3665  ;;  %v1469_v9 = vadd.f32 %v4335_v34, %v1455_v35  ;;  %v1470_v60 = vadd.f32 %v4335_v34, %v1456_v57  ;;  %v1485_v47 = vrot.slane %v1464_v42, 7 }
 0xcc4   :  { %v1487_v49 = vrot.slane %v1465_v15, 6  ;;  %v1489_v4 = vrot.slane %v1466_v61, 5  ;;  %v1491_v11 = vrot.slane %v1467_v63, 4  ;;  %v1772_v50 = vrot.slane %v3666_v55, 1 }
 0xcc5   :  { %v1486_v51 = vsel %vm104_vm0, %v1485_v47, %v1463_v58  ;;  %v1493_v52 = vrot.slane %v1468_v43, 3  ;;  %v1495_v53 = vrot.slane %v1469_v9, 2  ;;  %v1497_v13 = vrot.slane %v1470_v60, 1 }
 0xcc6   :  { %v1488_v54 = vsel %vm107_vm1, %v1487_v49, %v1486_v51  ;;  %v1773_v33 = vrot.slane %v3666_v55, 2  ;;  %v1774_v12 = vrot.slane %v3666_v55, 3  ;;  %v1775_v22 = vrot.slane %v3666_v55, 4 }
 0xcc7   :  { %v1490_v17 = vsel %vm110_vm2, %v1489_v4, %v1488_v54  ;;  %v1776_v23 = vrot.slane %v3666_v55, 5  ;;  %v1777_v41 = vrot.slane %v3666_v55, 6  ;;  %v1787_v8 = vmul.f32 %v3666_v55, %v4220_v56 }
 0xcc8   :  { %v1492_v36 = vsel %vm113_vm3, %v1491_v11, %v1490_v17  ;;  %v1788_v35 = vmul.f32 %v1772_v50, %v4224_v10  ;;  %v1789_v57 = vmul.f32 %v1773_v33, %v4227_v45  ;;  %v1790_v42 = vmul.f32 %v1774_v12, %v4230_v59 }
 0xcc9   :  { %v1494_v58 = vsel %vm116_vm4, %v1493_v52, %v1492_v36  ;;  %v1791_v15 = vmul.f32 %v1775_v22, %v4236_v46  ;;  %v1792_v61 = vmul.f32 %v1776_v23, %v4239_v0  ;;  %v1793_v63 = vmul.f32 %v1777_v41, %v4243_v19  ;;  %v85_v41 = vld [vmem:[%s4691_s7 + $0x30] sm:$0xff] }
 0xcca   :  { %v1496_v43 = vsel %vm119_vm5, %v1495_v53, %v1494_v58  ;;  %v1795_v56 = vmul.f32 %v3929_v26, %v1787_v8  ;;  %v1796_v55 = vmul.f32 %v3929_v26, %v1788_v35  ;;  %v1797_v10 = vmul.f32 %v3929_v26, %v1789_v57  ;;  %v86_v8 = vld [vmem:[%s4691_s7 + $0x38] sm:$0xff]  ;;  %v4438_v35 = vld [vmem:[%s4690_s6] ss:$0 sm:$0xff] }
 0xccb   :  { %v1498_v45 = vsel %vm122_vm6, %v1497_v13, %v1496_v43  ;;  %v1798_v59 = vmul.f32 %v3929_v26, %v1790_v42  ;;  %v1799_v9 = vmul.f32 %v3929_v26, %v1791_v15  ;;  %v1800_v46 = vmul.f32 %v3929_v26, %v1792_v61 }
 0xccc   :  { %3455 = vmatmul.mubr.msk.f32.vlgmr.msra.gmra.mrb[14].mxu0 %vm125_vm7, %v1498_v45  ;;  %v1801_v0 = vmul.f32 %v3929_v26, %v1793_v63  ;;  %v4378_v19 = vadd.f32 %v3939_v32, %v1795_v56  ;;  %v4381_v60 = vadd.f32 %v3939_v32, %v1796_v55  ;;  %v4384_v47 = vadd.f32 %v3939_v32, %v1797_v10  ;;  %v4472_v45 = vld [vmem:[%s4692_s8] ss:$0 sm:$0xff]  ;;  %s3752_s8 = smov [#allocation5]  }
 0xccd   :  { %3603 = vmatpush3.bf16.msra.mxu0 %v3910_v18  ;;  %3484 = vmatprep.mubr.msk.f32.mxu0 %vm3739_vm8, %v3740_v20  ;;  %v4390_v49 = vadd.f32 %v3939_v32, %v1798_v59  ;;  %v4393_v4 = vadd.f32 %v3939_v32, %v1799_v9  ;;  %v4397_v26 = vadd.f32 %v3939_v32, %v1800_v46 }
 0xcce   :  { %3604 = vmatprep.subr.bf16.mxu0 %v3738_v16  ;;  %v1819_v11 = vrot.slane %v4378_v19, 1  ;;  %v1821_v50 = vrot.slane %v4384_v47, 7  ;;  %v4402_v18 = vadd.f32 %v3939_v32, %v1801_v0  ;;  %v4406_v52 = vadd.f32 %v3939_v32, %v1802_v37 }
 0xccf   :  { %v1823_v51 = vrot.slane %v4390_v49, 6  ;;  %v1825_v54 = vrot.slane %v4393_v4, 5  ;;  %v1827_v12 = vrot.slane %v4397_v26, 4  ;;  %v4431_v36 = vpack.c.bf16 %v86_v8, %v85_v41 }
 0xcd0   :  { %v1820_v53 = vsel %vm104_vm0, %v4381_v60, %v1819_v11  ;;  %v1829_v32 = vrot.slane %v4402_v18, 3  ;;  %v1831_v17 = vrot.slane %v4406_v52, 2 }
 0xcd1   :  { %3606 = vmatpush3.bf16.msra.mxu0 %v3921_v21  ;;  %v1822_v13 = vsel %vm107_vm1, %v1821_v50, %v1820_v53  ;;  %3600 = vmatpush3.bf16.msra.mxu1 %v4431_v36 }
 0xcd2   :  { %v1824_v33 = vsel %vm110_vm2, %v1823_v51, %v1822_v13  ;;  %3487 = vmatprep.subr.mxu0 %v3740_v20  ;;  %3492 = vmatprep.subr.mxu1 %v3740_v20 }
 0xcd3   :  { %v1826_v22 = vsel %vm113_vm3, %v1825_v54, %v1824_v33 }
 0xcd4   :  { %v1828_v37 = vsel %vm116_vm4, %v1827_v12, %v1826_v22 }
 0xcd5   :  { %v1830_v21 = vsel %vm119_vm5, %v1829_v32, %v1828_v37 }
 0xcd6   :  { %v1832_v23 = vsel %vm122_vm6, %v1831_v17, %v1830_v21 }
 0xcd7   :  { %3485 = vmatmul.mubr.msk.f32.vlgmr.msra.gmra.mrb[16].mxu0 %vm125_vm7, %v1832_v23 }
 0xcd8   :  { %3489 = vmatprep.mubr.msk.f32.mxu0 %vm3739_vm8, %v3740_v20 }
 0xd9f   :  { %v1567_v57 = vpop.f32.mrb[14].mxu0 }
 0xda0   :  { %v1568_v42 = vadd.f32 %v4438_v35, %v1567_v57  ;;  %v3456_v58 = vpop.f32.mrb[15].mxu0 }
 0xda2   :  { %v1571_v15 = vmax.f32 %v1568_v42, 0.0 }
 0xda4   :  { %3474 = vmatmul.mubr.msk.f32.vlgmr.msra.gmra.mrb[12].mxu1 %vm1578_vm12, %v1571_v15 }
 0xda5   :  { %3494 = vmatprep.mubr.msk.f32.mxu1 %vm3739_vm8, %v3740_v20 }
 0xdaa   :  { %v1901_v61 = vpop.f32.mrb[16].mxu0 }
 0xdab   :  { %v4445_v63 = vadd.f32 %v3989_v29, %v1901_v61  ;;  %v3486_v43 = vpop.f32.mrb[17].mxu0 }
 0xdad   :  { %1907 = vrot.lane.b32.xlu1 %v4445_v63, %s3741_s15  ;;  %v4452_v56 = vmul.f32 0.35355338, %v4445_v63  ;;  %s3231_s15 = sshll.u32 %s3752_s8, 4  ;;  %s3232_s15 = int_to_ptr.vmem [resolvable:$true] %s3231_s15 }
 0xdae   :  { %p3714_p9 = scmp.lt.s32.totalorder %s3232_s15, %s3232_s15 }
 0xdb1   :  { %2073 = vrot.lane.b32.xlu1 %v4445_v63, %s3743_s17 }
 0xdb5   :  { %2071 = vrot.lane.b32.xlu1 %v4452_v56, %s3742_s16  ;;  %s3709_s16 = scalar_lea.vmem %s3232_s15, 256 }
 0xdb6   :  { %p3710_p8 = scmp.ne.s32.totalorder %s3232_s15, %s3709_s16  ;;  %p3715_p10 = scmp.lt.s32.totalorder %s3709_s16, %s3709_s16 }
 0xdb8   :  { %p3716_p11 = por %p3715_p10, %p3714_p9 }
 0xdba   :  { %p3717_p12 = pnand %p3716_p11, %p3710_p8 }
 0xe1f   :  { %v1908_v55 = vpop.permute.xlu1 %1907 }
 0xe20   :  { %3488 = vmatpush3.xpose.msk.msra.mxu0 %vm348_vm9, %v1908_v55 }
 0xe21   :  { %3497 = vmatprep.subr.mxu0 %v3740_v20 }
 0xe23   :  { %v2074_v29 = vpop.permute.xlu1 %2073  ;;  %3490 = vmatmul.mubr.msk.f32.vlgmr.msra.gmra.mrb[18].mxu0 %vm348_vm9, %v4452_v56 }
 0xe24   :  { %3498 = vmatpush3.xpose.msk.msra.mxu0 %vm348_vm9, %v2074_v29  ;;  %3499 = vmatprep.mubr.msk.f32.mxu0 %vm3739_vm8, %v3740_v20 }
 0xe25   :  { %3507 = vmatprep.subr.mxu0 %v3740_v20 }
 0xe27   :  { %v2072_v10 = vpop.permute.xlu1 %2071 }
 0xe28   :  { %3500 = vmatmul.mubr.msk.f32.vlgmr.msra.gmra.mrb[20].mxu0 %vm348_vm9, %v2072_v10 }
 0xe29   :  { %3508 = vmatpush3.msra.mxu0 %v4029_v62  ;;  %3509 = vmatprep.mubr.msk.f32.mxu0 %vm3739_vm8, %v3740_v20 }
 0xe2a   :  { %3517 = vmatprep.subr.mxu0 %v3740_v20 }
 0xe77   :  { %v1648_v59 = vpop.f32.mrb[12].mxu1 }
 0xe78   :  { %v1649_v9 = vadd.f32 %v4472_v45, %v1648_v59  ;;  %v3475_v46 = vpop.f32.mrb[13].mxu1 }
 0xe7a   :  { %v1653_v0 = vrot.slane %v1649_v9, 1  ;;  %v1654_v11 = vrot.slane %v1649_v9, 2  ;;  %v1655_v50 = vrot.slane %v1649_v9, 3  ;;  %v1656_v51 = vrot.slane %v1649_v9, 4 }
 0xe7b   :  { %v1657_v53 = vrot.slane %v1649_v9, 5  ;;  %v1658_v62 = vrot.slane %v1649_v9, 6  ;;  %v1659_v13 = vrot.slane %v1649_v9, 7  ;;  %v1668_v54 = vadd.f32 %v1649_v9, %v4133_v30 }
 0xe7c   :  { %v1669_v33 = vadd.f32 %v1653_v0, %v4118_v24  ;;  %v1670_v12 = vadd.f32 %v1654_v11, %v4121_v25  ;;  %v1671_v22 = vadd.f32 %v1655_v50, %v4124_v7  ;;  %v1672_v32 = vadd.f32 %v1656_v51, %v4127_v28 }
 0xe7d   :  { %v1673_v37 = vadd.f32 %v1657_v53, %v4136_v40  ;;  %v1674_v17 = vadd.f32 %v1658_v62, %v4141_v38  ;;  %v1675_v21 = vadd.f32 %v1659_v13, %v4144_v39  ;;  %1677 = vst.msk [vmem:[#allocation5] sm:$0x1] %vm1676_vm11, %v1668_v54 }
 0xe7e   :  { %1678 = vst.msk [vmem:[#allocation5 + $0x2] sm:$0x1] %vm1676_vm11, %v1669_v33  ;;  %1679 = vst.msk [vmem:[#allocation5 + $0x4] sm:$0x1] %vm1676_vm11, %v1670_v12 }
 0xe7f   :  { %1680 = vst.msk [vmem:[#allocation5 + $0x6] sm:$0x1] %vm1676_vm11, %v1671_v22  ;;  %1681 = vst.msk [vmem:[#allocation5 + $0x8] sm:$0x1] %vm1676_vm11, %v1672_v32 }
 0xe80   :  { %1682 = vst.msk [vmem:[#allocation5 + $0xa] sm:$0x1] %vm1676_vm11, %v1673_v37  ;;  %1683 = vst.msk [vmem:[#allocation5 + $0xc] sm:$0x1] %vm1676_vm11, %v1674_v17 }
 0xe81   :  { %1684 = vst.msk [vmem:[#allocation5 + $0xe] sm:$0x1] %vm1676_vm11, %v1675_v21 }
 0xef6   :  { %v1980_v24 = vpop.f32.mrb[18].mxu0 }
 0xef7   :  { %v3491_v25 = vpop.f32.mrb[19].mxu0  ;;  %v1984_v7 = vsel %vm348_vm9, %v1980_v24, -inf }
 0xef8   :  { %1985 = vmax.xlane.f32.xlu1 %v1984_v7 }
 0xefb   :  { %v2145_v28 = vpop.f32.mrb[20].mxu0 }
 0xefc   :  { %v3501_v30 = vpop.f32.mrb[21].mxu0  ;;  %v2149_v40 = vsel %vm348_vm9, %v2145_v28, -inf }
 0xefd   :  { %2150 = vmax.xlane.f32.xlu0 %v2149_v40 }
 0xf09   :  { %2160 = vrot.lane.b32.xlu1 %v4445_v63, %s3744_s2 }
 0xf85   :  { %v1986_v38 = vpop.xlane.xlu1 %1985 }
 0xf86   :  { %v1987_v39 = vsub.f32 %v1980_v24, %v1986_v38 }
 0xf88   :  { %v1988_v23 = vmul.f32 1.442695, %v1987_v39 }
 0xf89   :  { %v2161_v9 = vpop.permute.xlu1 %2160 }
 0xf8a   :  { %3667 = vpow2.f32 %v1988_v23  ;;  %v2151_v41 = vpop.xlane.xlu0 %2150 }
 0xf8b   :  { %v2152_v8 = vsub.f32 %v2145_v28, %v2151_v41 }
 0xf8d   :  { %v2153_v57 = vmul.f32 1.442695, %v2152_v8 }
 0xf8f   :  { %3669 = vpow2.f32 %v2153_v57 }
 0xf94   :  { %v3668_v42 = vpop.eup %3667 }
 0xf95   :  { %v1990_v58 = vsel %vm348_vm9, %v3668_v42, 0.0 }
 0xf96   :  { %1991 = vadd.xlane.f32.xlu0 %v1990_v58 }
 0xf99   :  { %v3670_v15 = vpop.eup %3669 }
 0xf9a   :  { %v2155_v61 = vsel %vm348_vm9, %v3670_v15, 0.0 }
 0xf9b   :  { %2156 = vadd.xlane.f32.xlu0 %v2155_v61 }
 0xfb1   :  { %1995 = vrot.lane.b32.xlu0 %v4445_v63, %s3745_s20 }
 0xfb5   :  { %2384 = vrot.lane.b32.xlu0 %v4445_v63, %s3746_s21 }
 0xfb9   :  { %2382 = vrot.lane.b32.xlu0 %v4452_v56, %s3747_s0 }
0x1023   :  { %v1992_v43 = vpop.xlane.xlu0 %1991 }
0x1024   :  { %3671 = vrcp.f32 %v1992_v43 }
0x1028   :  { %v2157_v55 = vpop.xlane.xlu0 %2156 }
0x1029   :  { %3673 = vrcp.f32 %v2157_v55 }
0x102c   :  { %v1996_v29 = vpop.permute.xlu0 %1995 }
0x102d   :  { %3493 = vmatpush3.msra.mxu1 %v1996_v29 }
0x102e   :  { %v3672_v10 = vpop.eup %3671  ;;  %3502 = vmatprep.subr.mxu1 %v3740_v20 }
0x102f   :  { %v1994_v59 = vmul.f32 %v3672_v10, %v3668_v42 }
0x1030   :  { %v2385_v51 = vpop.permute.xlu0 %2384 }
0x1031   :  { %3495 = vmatmul.mubr.msk.f32.vlgmr.msra.gmra.mrb[14].mxu1 %vm348_vm9, %v1994_v59 }
0x1032   :  { %3503 = vmatpush3.msra.mxu1 %v2161_v9  ;;  %3504 = vmatprep.mubr.msk.f32.mxu1 %vm3739_vm8, %v3740_v20 }
0x1033   :  { %v3674_v46 = vpop.eup %3673  ;;  %3512 = vmatprep.subr.mxu1 %v3740_v20 }
0x1034   :  { %v2159_v0 = vmul.f32 %v3674_v46, %v3670_v15 }
0x1036   :  { %3505 = vmatmul.mubr.msk.f32.vlgmr.msra.gmra.mrb[16].mxu1 %vm348_vm9, %v2159_v0 }
0x1037   :  { %3513 = vmatpush3.msra.mxu1 %v4044_v27  ;;  %3514 = vmatprep.mubr.msk.f32.mxu1 %vm3739_vm8, %v3740_v20  ;;  %v2383_v27 = vpop.permute.xlu0 %2382 }
0x1038   :  { %3522 = vmatprep.subr.mxu1 %v3740_v20 }
0x1104   :  { %v2067_v11 = vpop.f32.mrb[14].mxu1 }
0x1105   :  { %v3496_v50 = vpop.f32.mrb[15].mxu1  ;;  %3515 = vmatmul.mubr.msk.f32.vlgmr.msra.gmra.mrb[18].mxu1 %vm348_vm9, %v2067_v11 }
0x1106   :  { %3524 = vmatprep.mubr.msk.f32.mxu1 %vm3739_vm8, %v3740_v20 }
0x1109   :  { %v2232_v53 = vpop.f32.mrb[16].mxu1 }
0x110a   :  { %v3506_v62 = vpop.f32.mrb[17].mxu1  ;;  %3510 = vmatmul.mubr.msk.f32.vlgmr.msra.gmra.mrb[22].mxu0 %vm348_vm9, %v2232_v53 }
0x110b   :  { %3518 = vmatpush3.xpose.msk.msra.mxu0 %vm348_vm9, %v2385_v51  ;;  %3519 = vmatprep.mubr.msk.f32.mxu0 %vm3739_vm8, %v3740_v20 }
0x110c   :  { %3527 = vmatprep.subr.mxu0 %v3740_v20 }
0x110e   :  { %3520 = vmatmul.mubr.msk.f32.vlgmr.msra.gmra.mrb[24].mxu0 %vm348_vm9, %v2383_v27 }
0x110f   :  { %3528 = vmatpush3.msra.mxu0 %v4079_v14  ;;  %3529 = vmatprep.mubr.msk.f32.mxu0 %vm3739_vm8, %v3740_v20 }
0x1110   :  { %3537 = vmatprep.subr.mxu0 %v3740_v20 }
0x11d8   :  { %v2378_v13 = vpop.f32.mrb[18].mxu1 }
0x11d9   :  { %v3516_v54 = vpop.f32.mrb[19].mxu1 }
0x11dd   :  { %v2305_v33 = vpop.f32.mrb[22].mxu0 }
0x11de   :  { %v2379_v12 = vadd.f32 %v2378_v13, %v2305_v33  ;;  %v3511_v22 = vpop.f32.mrb[23].mxu0 }
0x11e1   :  { %v2456_v32 = vpop.f32.mrb[24].mxu0 }
0x11e2   :  { %v3521_v37 = vpop.f32.mrb[25].mxu0  ;;  %v2460_v17 = vsel %vm348_vm9, %v2456_v32, -inf }
0x11e3   :  { %2461 = vmax.xlane.f32.xlu0 %v2460_v17 }
0x11f9   :  { %2471 = vrot.lane.b32.xlu0 %v4445_v63, %s3748_s26 }
0x11fd   :  { %2621 = vrot.lane.b32.xlu0 %v4452_v56, %s3749_s27 }
0x1270   :  { %v2462_v14 = vpop.xlane.xlu0 %2461 }
0x1271   :  { %v2463_v21 = vsub.f32 %v2456_v32, %v2462_v14 }
0x1273   :  { %v2464_v24 = vmul.f32 1.442695, %v2463_v21 }
0x1274   :  { %v2472_v25 = vpop.permute.xlu0 %2471 }
0x1275   :  { %3675 = vpow2.f32 %v2464_v24  ;;  %3523 = vmatpush3.msra.mxu1 %v2472_v25 }
0x1276   :  { %3532 = vmatprep.subr.mxu1 %v3740_v20 }
0x1278   :  { %v2622_v39 = vpop.permute.xlu0 %2621 }
0x127f   :  { %v3676_v7 = vpop.eup %3675 }
0x1280   :  { %v2466_v28 = vsel %vm348_vm9, %v3676_v7, 0.0 }
0x1281   :  { %2467 = vadd.xlane.f32.xlu1 %v2466_v28 }
0x1292   :  { %2623 = vrot.lane.b32.xlu1 %v4445_v63, %s3750_s28 }
0x130e   :  { %v2468_v30 = vpop.xlane.xlu1 %2467 }
0x130f   :  { %3677 = vrcp.f32 %v2468_v30 }
0x1312   :  { %v2624_v56 = vpop.permute.xlu1 %2623 }
0x1319   :  { %v3678_v40 = vpop.eup %3677 }
0x131a   :  { %v2470_v38 = vmul.f32 %v3678_v40, %v3676_v7 }
0x131c   :  { %3525 = vmatmul.mubr.msk.f32.vlgmr.msra.gmra.mrb[20].mxu1 %vm348_vm9, %v2470_v38 }
0x131d   :  { %3533 = vmatpush3.xpose.msk.msra.mxu1 %vm348_vm9, %v2624_v56  ;;  %3534 = vmatprep.mubr.msk.f32.mxu1 %vm3739_vm8, %v3740_v20 }
0x131e   :  { %3542 = vmatprep.subr.mxu1 %v3740_v20 }
0x1320   :  { %3535 = vmatmul.mubr.msk.f32.vlgmr.msra.gmra.mrb[22].mxu1 %vm348_vm9, %v2622_v39 }
0x1321   :  { %3543 = vmatpush3.msra.mxu1 %v4093_v44  ;;  %3544 = vmatprep.mubr.msk.f32.mxu1 %vm3739_vm8, %v3740_v20 }
0x1322   :  { %3613 = vmatprep.subr.bf16.mxu1 %v3738_v16 }
0x13ef   :  { %v2543_v23 = vpop.f32.mrb[20].mxu1 }
0x13f0   :  { %v3526_v41 = vpop.f32.mrb[21].mxu1  ;;  %3530 = vmatmul.mubr.msk.f32.vlgmr.msra.gmra.mrb[26].mxu0 %vm348_vm9, %v2543_v23 }
0x13f1   :  { %3539 = vmatprep.mubr.msk.f32.mxu0 %vm3739_vm8, %v3740_v20 }
0x13f3   :  { %v2695_v8 = vpop.f32.mrb[22].mxu1 }
0x13f4   :  { %v3536_v57 = vpop.f32.mrb[23].mxu1  ;;  %v2699_v42 = vsel %vm348_vm9, %v2695_v8, -inf }
0x13f5   :  { %2700 = vmax.xlane.f32.xlu0 %v2699_v42 }
0x140b   :  { %2710 = vrot.lane.b32.xlu0 %v4445_v63, %s3751_s9 }
0x1482   :  { %v2701_v44 = vpop.xlane.xlu0 %2700 }
0x1483   :  { %v2702_v58 = vsub.f32 %v2695_v8, %v2701_v44 }
0x1485   :  { %v2703_v15 = vmul.f32 1.442695, %v2702_v58 }
0x1486   :  { %v2711_v61 = vpop.permute.xlu0 %2710 }
0x1487   :  { %3679 = vpow2.f32 %v2703_v15  ;;  %3538 = vmatpush3.msra.mxu0 %v2711_v61 }
0x1488   :  { %3607 = vmatprep.subr.bf16.mxu0 %v3738_v16 }
0x1491   :  { %v3680_v43 = vpop.eup %3679 }
0x1492   :  { %v2705_v55 = vsel %vm348_vm9, %v3680_v43, 0.0 }
0x1493   :  { %2706 = vadd.xlane.f32.xlu1 %v2705_v55 }
0x14c3   :  { %v2616_v29 = vpop.f32.mrb[26].mxu0 }
0x14c4   :  { %v2620_v10 = vadd.f32 %v2616_v29, %v2379_v12  ;;  %v3531_v59 = vpop.f32.mrb[27].mxu0 }
0x1520   :  { %v2707_v9 = vpop.xlane.xlu1 %2706 }
0x1521   :  { %3681 = vrcp.f32 %v2707_v9 }
0x152b   :  { %v3682_v46 = vpop.eup %3681 }
0x152c   :  { %v2709_v0 = vmul.f32 %v3682_v46, %v3680_v43 }
0x152e   :  { %3540 = vmatmul.mubr.msk.f32.vlgmr.msra.gmra.mrb[28].mxu0 %vm348_vm9, %v2709_v0 }
0x152f   :  { %3609 = vmatpush3.bf16.msra.mxu0 %v4278_v1  ;;  %3555 = vmatprep.mubr.msk.f32.mxu0 %vm3739_vm8, %v3740_v20 }
0x1530   :  { %3610 = vmatprep.subr.bf16.mxu0 %v3738_v16 }
0x1533   :  { %3612 = vmatpush3.bf16.msra.mxu0 %v4284_v3 }
0x1601   :  { %v2782_v63 = vpop.f32.mrb[28].mxu0 }
0x1602   :  { %v3541_v11 = vpop.f32.mrb[29].mxu0  ;;  %3545 = vmatmul.mubr.msk.f32.vlgmr.msra.gmra.mrb[24].mxu1 %vm348_vm9, %v2782_v63 }
0x1603   :  { %3615 = vmatpush3.bf16.msra.mxu1 %v4298_v5  ;;  %3574 = vmatprep.mubr.msk.f32.mxu1 %vm3739_vm8, %v3740_v20 }
0x1604   :  { %3616 = vmatprep.subr.bf16.mxu1 %v3738_v16 }
0x1607   :  { %3618 = vmatpush3.bf16.msra.mxu1 %v4304_v6 }
0x1608   :  { %3619 = vmatprep.subr.bf16.mxu1 %v3738_v16 }
0x160b   :  { %3621 = vmatpush3.bf16.msra.mxu1 %v4314_v31 }
0x160c   :  { %3622 = vmatprep.subr.bf16.mxu1 %v3738_v16 }
0x160f   :  { %3624 = vmatpush3.bf16.msra.mxu1 %v4431_v36 }
0x16d5   :  { %v2855_v1 = vpop.f32.mrb[24].mxu1 }
0x16d6   :  { %v2859_v3 = vadd.f32 %v2855_v1, %v2620_v10  ;;  %v3546_v50 = vpop.f32.mrb[25].mxu1 }
0x16d8   :  { %v2860_v5 = vadd.f32 %v4107_v48, %v2859_v3 }
0x16da   :  { %v2862_v51 = vrot.slane %v2860_v5, 7  ;;  %v2863_v53 = vrot.slane %v2860_v5, 1  ;;  %v2864_v20 = vrot.slane %v2860_v5, 2  ;;  %v2865_v62 = vrot.slane %v2860_v5, 3 }
0x16db   :  { %v2866_v27 = vrot.slane %v2860_v5, 4  ;;  %v2867_v13 = vrot.slane %v2860_v5, 5  ;;  %v4571_v6 = vadd.f32 %v2860_v5, %v4381_v60  ;;  %v2868_v12 = vrot.slane %v2860_v5, 6 }
0x16dc   :  { %v4574_v31 = vadd.f32 %v2862_v51, %v4378_v19  ;;  %v4577_v16 = vadd.f32 %v2863_v53, %v4384_v47  ;;  %v4580_v36 = vadd.f32 %v2864_v20, %v4390_v49  ;;  %v4583_v48 = vadd.f32 %v2865_v62, %v4393_v4 }
0x16dd   :  { %v4586_v54 = vadd.f32 %v2866_v27, %v4397_v26  ;;  %v2893_v33 = vrot.slane %v4571_v6, 7  ;;  %v4590_v60 = vadd.f32 %v2867_v13, %v4402_v18  ;;  %v4601_v37 = vadd.f32 %v2868_v12, %v4406_v52 }
0x16de   :  { %v2895_v19 = vrot.slane %v4577_v16, 6  ;;  %v2897_v47 = vrot.slane %v4580_v36, 5  ;;  %v2899_v4 = vrot.slane %v4583_v48, 4 }
0x16df   :  { %v2894_v49 = vsel %vm107_vm1, %v2893_v33, %v4574_v31  ;;  %v2901_v32 = vrot.slane %v4586_v54, 3  ;;  %v2903_v17 = vrot.slane %v4590_v60, 2  ;;  %v2905_v25 = vrot.slane %v4601_v37, 1 }
0x16e0   :  { %v2896_v22 = vsel %vm110_vm2, %v2895_v19, %v2894_v49 }
0x16e1   :  { %v2898_v26 = vsel %vm113_vm3, %v2897_v47, %v2896_v22  ;;  %v2911_v7 = vsel %vm1676_vm11, %v2905_v25, 0.0 }
0x16e2   :  { %v2900_v18 = vsel %vm116_vm4, %v2899_v4, %v2898_v26 }
0x16e3   :  { %v2902_v14 = vsel %vm119_vm5, %v2901_v32, %v2900_v18 }
0x16e4   :  { %v2904_v21 = vsel %vm122_vm6, %v2903_v17, %v2902_v14 }
0x16e5   :  { %v2908_v24 = vsel %vm1693_vm10, %v2904_v21, 0.0 }
0x16e6   :  { %2909 = vadd.xlane.f32.xlu1 %v2908_v24 }
0x16ea   :  { %2912 = vadd.xlane.f32.xlu1 %v2911_v7 }
0x1773   :  { %v2910_v28 = vpop.xlane.xlu1 %2909 }
0x1774   :  { %v2914_v30 = vmul.f32 0.03125, %v2910_v28 }
0x1776   :  { %v2918_v52 = vrot.slane %v2914_v30, 1  ;;  %v2919_v40 = vrot.slane %v2914_v30, 2  ;;  %v2920_v38 = vrot.slane %v2914_v30, 3  ;;  %v2921_v56 = vrot.slane %v2914_v30, 4 }
0x1777   :  { %v2913_v39 = vpop.xlane.xlu1 %2912  ;;  %v2922_v23 = vrot.slane %v2914_v30, 5  ;;  %v2923_v41 = vrot.slane %v2914_v30, 6  ;;  %v2933_v8 = vsub.f32 %v4574_v31, %v2914_v30 }
0x1778   :  { %v2915_v57 = vmul.f32 0.03125, %v2913_v39  ;;  %v2934_v42 = vsub.f32 %v4571_v6, %v2918_v52  ;;  %v2935_v44 = vsub.f32 %v4577_v16, %v2919_v40  ;;  %v2936_v58 = vsub.f32 %v4580_v36, %v2920_v38 }
0x1779   :  { %v2937_v15 = vsub.f32 %v4583_v48, %v2921_v56  ;;  %v2938_v61 = vsub.f32 %v4586_v54, %v2922_v23  ;;  %v2939_v43 = vsub.f32 %v4590_v60, %v2923_v41  ;;  %v2941_v9 = vmul.f32 %v2933_v8, %v2933_v8 }
0x177a   :  { %v2924_v55 = vrot.slane %v2915_v57, 7  ;;  %v2942_v29 = vmul.f32 %v2934_v42, %v2934_v42  ;;  %v2943_v10 = vmul.f32 %v2935_v44, %v2935_v44  ;;  %v2944_v59 = vmul.f32 %v2936_v58, %v2936_v58 }
0x177b   :  { %v2945_v46 = vmul.f32 %v2937_v15, %v2937_v15  ;;  %v2946_v63 = vmul.f32 %v2938_v61, %v2938_v61  ;;  %v2947_v3 = vmul.f32 %v2939_v43, %v2939_v43 }
0x177c   :  { %v2940_v0 = vsub.f32 %v4601_v37, %v2924_v55  ;;  %v2957_v11 = vrot.slane %v2942_v29, 7  ;;  %v2959_v1 = vrot.slane %v2943_v10, 6  ;;  %v2961_v5 = vrot.slane %v2944_v59, 5 }
0x177d   :  { %v2963_v53 = vrot.slane %v2945_v46, 4  ;;  %v2965_v62 = vrot.slane %v2946_v63, 3  ;;  %v2967_v33 = vrot.slane %v2947_v3, 2 }
0x177e   :  { %v2958_v50 = vsel %vm107_vm1, %v2957_v11, %v2941_v9  ;;  %v2948_v27 = vmul.f32 %v2940_v0, %v2940_v0 }
0x177f   :  { %v2960_v51 = vsel %vm110_vm2, %v2959_v1, %v2958_v50 }
0x1780   :  { %v2962_v20 = vsel %vm113_vm3, %v2961_v5, %v2960_v51  ;;  %v2969_v49 = vrot.slane %v2948_v27, 1 }
0x1781   :  { %v2964_v13 = vsel %vm116_vm4, %v2963_v53, %v2962_v20 }
0x1782   :  { %v2966_v12 = vsel %vm119_vm5, %v2965_v62, %v2964_v13  ;;  %v2975_v22 = vsel %vm1676_vm11, %v2969_v49, 0.0 }
0x1783   :  { %v2968_v19 = vsel %vm122_vm6, %v2967_v33, %v2966_v12 }
0x1784   :  { %v2972_v47 = vsel %vm1693_vm10, %v2968_v19, 0.0 }
0x1785   :  { %2973 = vadd.xlane.f32.xlu1 %v2972_v47 }
0x1789   :  { %2976 = vadd.xlane.f32.xlu1 %v2975_v22 }
0x1812   :  { %v2974_v4 = vpop.xlane.xlu1 %2973 }
0x1813   :  { %v2978_v26 = vmul.f32 0.03125, %v2974_v4 }
0x1815   :  { %v2980_v32 = vadd.f32 1e-05, %v2978_v26 }
0x1816   :  { %v2977_v18 = vpop.xlane.xlu1 %2976 }
0x1817   :  { %3683 = vrsqrt.f32 %v2980_v32  ;;  %v2979_v17 = vmul.f32 0.03125, %v2977_v18 }
0x1819   :  { %v2981_v14 = vadd.f32 1e-05, %v2979_v17 }
0x181b   :  { %3685 = vrsqrt.f32 %v2981_v14 }
0x1821   :  { %v3684_v21 = vpop.eup %3683 }
0x1822   :  { %v2986_v24 = vrot.slane %v3684_v21, 1  ;;  %v2987_v25 = vrot.slane %v3684_v21, 2  ;;  %v2988_v7 = vrot.slane %v3684_v21, 3  ;;  %v2989_v28 = vrot.slane %v3684_v21, 4 }
0x1823   :  { %v2990_v30 = vrot.slane %v3684_v21, 5  ;;  %v2991_v52 = vrot.slane %v3684_v21, 6  ;;  %v3001_v40 = vmul.f32 %v3684_v21, %v2933_v8 }
0x1824   :  { %v3002_v38 = vmul.f32 %v2986_v24, %v2934_v42  ;;  %v3003_v56 = vmul.f32 %v2987_v25, %v2935_v44  ;;  %v3004_v39 = vmul.f32 %v2988_v7, %v2936_v58  ;;  %v3005_v23 = vmul.f32 %v2989_v28, %v2937_v15 }
0x1825   :  { %v3686_v41 = vpop.eup %3685  ;;  %v3006_v57 = vmul.f32 %v2990_v30, %v2938_v61  ;;  %v3007_v55 = vmul.f32 %v2991_v52, %v2939_v43  ;;  %v3009_v29 = vmul.f32 %v4322_v2, %v3001_v40 }
0x1826   :  { %v2992_v10 = vrot.slane %v3686_v41, 7  ;;  %v3010_v59 = vmul.f32 %v4322_v2, %v3002_v38  ;;  %v3011_v9 = vmul.f32 %v4322_v2, %v3003_v56  ;;  %v3012_v46 = vmul.f32 %v4322_v2, %v3004_v39 }
0x1827   :  { %v3013_v63 = vmul.f32 %v4322_v2, %v3005_v23  ;;  %v3014_v8 = vmul.f32 %v4322_v2, %v3006_v57  ;;  %v3015_v42 = vmul.f32 %v4322_v2, %v3007_v55  ;;  %v3017_v44 = vadd.f32 %v4335_v34, %v3009_v29 }
0x1828   :  { %v3008_v58 = vmul.f32 %v2992_v10, %v2940_v0  ;;  %v3018_v15 = vadd.f32 %v4335_v34, %v3010_v59  ;;  %v3019_v61 = vadd.f32 %v4335_v34, %v3011_v9  ;;  %v3020_v43 = vadd.f32 %v4335_v34, %v3012_v46 }
0x1829   :  { %v3021_v11 = vadd.f32 %v4335_v34, %v3013_v63  ;;  %v3022_v1 = vadd.f32 %v4335_v34, %v3014_v8  ;;  %v3033_v3 = vrot.slane %v3017_v44, 1  ;;  %v3023_v5 = vadd.f32 %v4335_v34, %v3015_v42 }
0x182a   :  { %v3016_v50 = vmul.f32 %v4322_v2, %v3008_v58  ;;  %v3035_v51 = vrot.slane %v3019_v61, 7  ;;  %v3037_v53 = vrot.slane %v3020_v43, 6 }
0x182b   :  { %v3034_v20 = vsel %vm104_vm0, %v3018_v15, %v3033_v3  ;;  %v3039_v27 = vrot.slane %v3021_v11, 5  ;;  %v3041_v33 = vrot.slane %v3022_v1, 4  ;;  %v3043_v47 = vrot.slane %v3023_v5, 3 }
0x182c   :  { %v3024_v0 = vadd.f32 %v4335_v34, %v3016_v50  ;;  %v3036_v62 = vsel %vm107_vm1, %v3035_v51, %v3034_v20 }
0x182d   :  { %v3038_v13 = vsel %vm110_vm2, %v3037_v53, %v3036_v62 }
0x182e   :  { %v3045_v12 = vrot.slane %v3024_v0, 2  ;;  %v3040_v19 = vsel %vm113_vm3, %v3039_v27, %v3038_v13 }
0x182f   :  { %v3042_v2 = vsel %vm116_vm4, %v3041_v33, %v3040_v19 }
0x1830   :  { %v3044_v49 = vsel %vm119_vm5, %v3043_v47, %v3042_v2 }
0x1831   :  { %v3046_v22 = vsel %vm122_vm6, %v3045_v12, %v3044_v49 }
0x1832   :  { %3556 = vmatmul.mubr.msk.f32.vlgmr.msra.gmra.mrb[30].mxu0 %vm125_vm7, %v3046_v22 }
0x1905   :  { %v3115_v4 = vpop.f32.mrb[30].mxu0 }
0x1906   :  { %v3116_v34 = vadd.f32 %v4438_v35, %v3115_v4  ;;  %v3557_v26 = vpop.f32.mrb[31].mxu0 }
0x1908   :  { %v3119_v32 = vmax.f32 %v3116_v34, 0.0 }
0x190a   :  { %3575 = vmatmul.mubr.msk.f32.vlgmr.msra.gmra.mrb[26].mxu1 %vm1578_vm12, %v3119_v32 }
0x19dd   :  { %v3189_v18 = vpop.f32.mrb[26].mxu1 }
0x19de   :  { %v3190_v17 = vadd.f32 %v4472_v45, %v3189_v18  ;;  %v3576_v14 = vpop.f32.mrb[27].mxu1 }
0x19e0   :  { %v3194_v21 = vrot.slane %v3190_v17, 7  ;;  %v3195_v24 = vrot.slane %v3190_v17, 1  ;;  %v3196_v25 = vrot.slane %v3190_v17, 2  ;;  %v3197_v7 = vrot.slane %v3190_v17, 3 }
0x19e1   :  { %v3198_v28 = vrot.slane %v3190_v17, 4  ;;  %v3199_v30 = vrot.slane %v3190_v17, 5  ;;  %v3200_v52 = vrot.slane %v3190_v17, 6  ;;  %v3210_v35 = vadd.f32 %v3190_v17, %v4571_v6 }
0x19e2   :  { %v3209_v40 = vadd.f32 %v3194_v21, %v4574_v31  ;;  %v3211_v38 = vadd.f32 %v3195_v24, %v4577_v16  ;;  %v3212_v56 = vadd.f32 %v3196_v25, %v4580_v36  ;;  %v3213_v45 = vadd.f32 %v3197_v7, %v4583_v48 }
0x19e3   :  { %v3214_v39 = vadd.f32 %v3198_v28, %v4586_v54  ;;  %v3215_v23 = vadd.f32 %v3199_v30, %v4590_v60  ;;  %v3216_v41 = vadd.f32 %v3200_v52, %v4601_v37  ;;  %3219 = vst.msk [vmem:[#allocation5 + $0x2] sm:$0x2] %vm3217_vm13, %v3210_v35 }
0x19e4   :  { %3218 = vst.msk [vmem:[#allocation5] sm:$0x2] %vm3217_vm13, %v3209_v40  ;;  %3220 = vst.msk [vmem:[#allocation5 + $0x4] sm:$0x2] %vm3217_vm13, %v3211_v38 }
0x19e5   :  { %3221 = vst.msk [vmem:[#allocation5 + $0x6] sm:$0x2] %vm3217_vm13, %v3212_v56  ;;  %3222 = vst.msk [vmem:[#allocation5 + $0x8] sm:$0x2] %vm3217_vm13, %v3213_v45 }
0x19e6   :  { %3223 = vst.msk [vmem:[#allocation5 + $0xa] sm:$0x2] %vm3217_vm13, %v3214_v39  ;;  %3224 = vst.msk [vmem:[#allocation5 + $0xc] sm:$0x2] %vm3217_vm13, %v3215_v23 }
0x19e7   :  { %3225 = vst.msk [vmem:[#allocation5 + $0xe] sm:$0x2] %vm3217_vm13, %v3216_v41 }
0x19e8   :  { %3720 = shalt.err (!%p3717_p12)
}
0x19e9   :  { %s3721_s20 = scalar_lea.hbm %s4697_s13, 256 }
0x19ea   :  { %p3722_p13 = scmp.ne.s32.totalorder %s4697_s13, %s3721_s20  ;;  %p3725_p0 = scmp.lt.u32.totalorder %s3721_s20, %s4697_s13 }
0x19ec   :  { %p3727_p1 = pnand %p3725_p0, %p3722_p13 }
0x19ee   :  { %3730 = shalt.err (!%p3727_p1)
}
0x19ef   :  { %3237 = dma.vmem_to_hbm [thread:$0]  %s3232_s15, 256, %s4697_s13, [#allocation4], %s3736_s18, %s3736_s18, %s3737_s19  }
0x19f0   :  { %3733 = dma.done.wait [#allocation4], 256  }
0x19f1   :  { %3734 = vsyncadd [#allocation4], 4294967040 }
0x19f2   :  { %3241 = vsyncpa [#allocation3], 1 }
0x19f3   :  { %3242 = vsyncpa [#allocation4], 1 }

</bundles_post_ra>
